<compile_context>
chip_gen: v5e
topology: v5e:2x2
jax: 0.10.0
libtpu: 0.0.40
codegen_flags: <defaults>
</compile_context>

<pallas_src>
import functools

import numpy as np
import jax
import jax.numpy as jnp
from jax.experimental import pallas as pl
from jax.experimental.pallas import tpu as pltpu


# ----------------------------------------------------------------------------
# Pooled-pyramid matrix (identity block stripped):
#   P @ x == concat([pool1(x), pool2(x), pool3(x)]) along the sequence axis.
# (AvgPool1d default stride == kernel_size, no padding -> floor truncation.)
# ----------------------------------------------------------------------------
def _build_pool_matrix(length, windows):
    blocks = []
    cur = np.eye(length, dtype=np.float64)  # maps x -> current pyramid level
    cur_len = length
    for w in windows:
        n = cur_len // w
        if n <= 0:
            raise ValueError(
                f"sequence length {cur_len} too short for AvgPool1d window {w}"
            )
        p = np.zeros((n, cur_len), dtype=np.float64)
        for j in range(n):
            p[j, j * w:(j + 1) * w] = 1.0 / w
        cur = p @ cur
        cur_len = n
        blocks.append(cur)
    return np.concatenate(blocks, axis=0)  # (L_total - L, L)


# ----------------------------------------------------------------------------
# Fused Pallas kernel: pooled rows via one small MXU matmul + LayerNorm,
# identity rows LayerNorm-ed directly.  Handles a (TB, L, D) batch block.
# ----------------------------------------------------------------------------
def _avgpool_construct_kernel(p_ref, x_ref, g_ref, b_ref, o_ref, *, eps):
    gamma = g_ref[...].astype(jnp.float32)  # (1, D)
    beta = b_ref[...].astype(jnp.float32)   # (1, D)
    p = p_ref[...]                           # (M_pool, L), compute dtype (bf16)

    def layer_norm(v):  # v: (rows, D) f32 -> normalized + affine
        # one-pass stats: var = E[x^2] - mu^2 (eps absorbs the tiny bias)
        mu = jnp.mean(v, axis=-1, keepdims=True)
        ms = jnp.mean(v * v, axis=-1, keepdims=True)
        inv = jax.lax.rsqrt((ms - mu * mu) + eps)
        return (v - mu) * inv * gamma + beta

    tb = x_ref.shape[0]
    n_top = x_ref.shape[1]
    for t in range(tb):
        xt = x_ref[t]                                        # (L, D) native dtype
        # top L rows: LayerNorm of the input directly (exact, no MXU work)
        o_ref[t, :n_top, :] = layer_norm(xt.astype(jnp.float32)).astype(o_ref.dtype)
        # pooled pyramid rows: one MXU matmul, bf16 operands, f32 accumulation
        pooled = jnp.dot(p, xt.astype(p.dtype),
                         preferred_element_type=jnp.float32)  # (M_pool, D)
        o_ref[t, n_top:, :] = layer_norm(pooled).astype(o_ref.dtype)


def avg_pooling_construct(x, gamma, beta, window_size, *, eps=1e-5,
                          compute_dtype=jnp.bfloat16,
                          vmem_budget_bytes=8 * 1024 * 1024):
    """Forward pass of AvgPooling_Construct.

    x:     (B, L, D)  (any float dtype; output matches x.dtype)
    gamma: (D,)       LayerNorm weight
    beta:  (D,)       LayerNorm bias
    window_size: int or list/tuple of 3 ints (as in the PyTorch module)
    returns (B, L_total, D) with L_total = L + L//w1 + (L//w1)//w2 + ...
    """
    B, L, D = x.shape
    if isinstance(window_size, (list, tuple)):
        windows = (int(window_size[0]), int(window_size[1]), int(window_size[2]))
    else:
        windows = (int(window_size),) * 3

    pool_np = _build_pool_matrix(L, windows)          # (M_pool, L)
    m_pool = pool_np.shape[0]
    l_total = L + m_pool
    # 1/4, 1/16, 1/64 (power-of-two windows) are exact in bf16.
    p = jnp.asarray(pool_np.astype(np.float32)).astype(compute_dtype)

    out_dtype = x.dtype
    gamma2 = gamma.reshape(1, D).astype(jnp.float32)
    beta2 = beta.reshape(1, D).astype(jnp.float32)

    # Pack TB batch elements per grid step, bounded by a conservative VMEM
    # budget (double-buffered input + output slabs), so it also fits v7x.
    in_b = x.dtype.itemsize
    out_b = jnp.dtype(out_dtype).itemsize
    per_batch = 2 * (L * D * in_b + l_total * D * out_b)
    tb = 1
    for cand in range(1, B + 1):
        if B % cand == 0 and cand * per_batch <= vmem_budget_bytes:
            tb = cand

    kern = functools.partial(_avgpool_construct_kernel, eps=eps)
    cost = pl.CostEstimate(
        flops=2 * B * m_pool * L * D,
        transcendentals=B * l_total,
        bytes_accessed=(B * L * D * in_b + B * l_total * D * out_b
                        + m_pool * L * jnp.dtype(compute_dtype).itemsize
                        + 2 * D * 4),
    )

    def _call(single_buffer_p):
        p_spec_kwargs = {}
        if single_buffer_p:
            # constant index map -> second buffer is dead weight; single-buffer it
            p_spec_kwargs = dict(pipeline_mode=pl.Buffered(1))
        return pl.pallas_call(
            kern,
            out_shape=jax.ShapeDtypeStruct((B, l_total, D), out_dtype),
            grid=(B // tb,),
            in_specs=[
                pl.BlockSpec((m_pool, L), lambda i: (0, 0), **p_spec_kwargs),
                pl.BlockSpec((tb, L, D), lambda i: (i, 0, 0)),
                pl.BlockSpec((1, D), lambda i: (0, 0)),
                pl.BlockSpec((1, D), lambda i: (0, 0)),
            ],
            out_specs=pl.BlockSpec((tb, l_total, D), lambda i: (i, 0, 0)),
            compiler_params=pltpu.CompilerParams(
                dimension_semantics=("parallel",),
            ),
            cost_estimate=cost,
        )(p, x, gamma2, beta2)

    try:
        return _call(True)
    except Exception:
        # Fallback for JAX builds where pipeline_mode/Buffered(1) is not
        # supported on the top-level pallas_call pipeline.
        return _call(False)


# ----------------------------------------------------------------------------
# Pure-JAX reference (mirrors the PyTorch module) for a correctness check.
# ----------------------------------------------------------------------------
def _reference(x, gamma, beta, window_size, *, eps=1e-5):
    if isinstance(window_size, (list, tuple)):
        windows = (int(window_size[0]), int(window_size[1]), int(window_size[2]))
    else:
        windows = (int(window_size),) * 3
    pieces = [x]
    cur = x
    for w in windows:
        n = cur.shape[1] // w
        cur = jnp.mean(
            cur[:, : n * w, :].reshape(cur.shape[0], n, w, cur.shape[2]), axis=2
        )
        pieces.append(cur)
    cat = jnp.concatenate(pieces, axis=1)
    mu = jnp.mean(cat, axis=-1, keepdims=True)
    var = jnp.mean(jnp.square(cat - mu), axis=-1, keepdims=True)
    return (cat - mu) / jnp.sqrt(var + eps) * gamma + beta


if __name__ == "__main__":
    # small, deterministic example: batch=2, seq=64, d_model=128, window=4
    B, L, D = 2, 64, 128
    window_size = 4  # -> pyramid lengths 64, 16, 4, 1  (L_total = 85)

    key = jax.random.PRNGKey(0)
    kx, kg, kb = jax.random.split(key, 3)
    x = jax.random.normal(kx, (B, L, D), jnp.float32)
    gamma = 1.0 + 0.1 * jax.random.normal(kg, (D,), jnp.float32)
    beta = 0.1 * jax.random.normal(kb, (D,), jnp.float32)

    out = jax.block_until_ready(avg_pooling_construct(x, gamma, beta, window_size))
    ref = jax.block_until_ready(_reference(x, gamma, beta, window_size))

    l_total = L + L // 4 + L // 16 + L // 64
    assert out.shape == (B, l_total, D)
    assert out.shape == ref.shape
    assert bool(jnp.all(jnp.isfinite(out)))
    # identity rows are computed entirely in f32 -> tight match
    assert bool(jnp.allclose(out[:, :L], ref[:, :L], atol=1e-3, rtol=1e-3))
    # pooled pyramid rows go through a bf16 MXU matmul with f32 accumulation
    assert bool(jnp.allclose(out, ref, atol=2e-2, rtol=2e-2))
    print("KERNEL_OK")
</pallas_src>

<mosaic_0001>
module attributes {stable_mosaic.version = 11 : i64} {
  func.func @_avgpool_construct_kernel(%arg0: i32, %arg1: memref<21x64xbf16, #tpu.memory_space<vmem>>, %arg2: memref<2x64x128xf32, #tpu.memory_space<vmem>>, %arg3: memref<1x128xf32, #tpu.memory_space<vmem>>, %arg4: memref<1x128xf32, #tpu.memory_space<vmem>>, %arg5: memref<2x85x128xf32, #tpu.memory_space<vmem>>) attributes {dimension_semantics = [#tpu.dimension_semantics<parallel>], iteration_bounds = array<i64: 1>, scalar_prefetch = 0 : i64, scratch_operands = 0 : i64, tpu.core_type = #tpu.core_type<tc>, window_params = [{pipeline_mode = #tpu.pipeline_mode<synchronous>, transform_indices = @transform_0, window_bounds = array<i64: 21, 64>}, {transform_indices = @transform_1, window_bounds = array<i64: 2, 64, 128>}, {pipeline_mode = #tpu.pipeline_mode<synchronous>, transform_indices = @transform_2, window_bounds = array<i64: 1, 128>}, {pipeline_mode = #tpu.pipeline_mode<synchronous>, transform_indices = @transform_3, window_bounds = array<i64: 1, 128>}, {transform_indices = @transform_4, window_bounds = array<i64: 2, 85, 128>}]} {
    %c0 = arith.constant 0 : index
    %c0_0 = arith.constant 0 : index
    %0 = vector.load %arg3[%c0, %c0_0] : memref<1x128xf32, #tpu.memory_space<vmem>>, vector<1x128xf32>
    %c0_1 = arith.constant 0 : index
    %c0_2 = arith.constant 0 : index
    %1 = vector.load %arg4[%c0_1, %c0_2] : memref<1x128xf32, #tpu.memory_space<vmem>>, vector<1x128xf32>
    %c0_3 = arith.constant 0 : index
    %c0_4 = arith.constant 0 : index
    %2 = vector.load %arg1[%c0_3, %c0_4] : memref<21x64xbf16, #tpu.memory_space<vmem>>, vector<21x64xbf16>
    %c0_5 = arith.constant 0 : index
    %c0_6 = arith.constant 0 : index
    %c0_7 = arith.constant 0 : index
    %3 = vector.load %arg2[%c0_5, %c0_6, %c0_7] : memref<2x64x128xf32, #tpu.memory_space<vmem>>, vector<1x64x128xf32>
    %4 = vector.shape_cast %3 : vector<1x64x128xf32> to vector<64x128xf32>
    %cst = arith.constant dense<0.000000e+00> : vector<64xf32>
    %5 = vector.multi_reduction <add>, %4, %cst [1] : vector<64x128xf32> to vector<64xf32>
    %6 = vector.shape_cast %5 : vector<64xf32> to vector<64x1xf32>
    %cst_8 = arith.constant 1.280000e+02 : f32
    %7 = vector.broadcast %cst_8 : f32 to vector<64x1xf32>
    %8 = arith.divf %6, %7 : vector<64x1xf32>
    %9 = arith.mulf %4, %4 : vector<64x128xf32>
    %cst_9 = arith.constant dense<0.000000e+00> : vector<64xf32>
    %10 = vector.multi_reduction <add>, %9, %cst_9 [1] : vector<64x128xf32> to vector<64xf32>
    %11 = vector.shape_cast %10 : vector<64xf32> to vector<64x1xf32>
    %cst_10 = arith.constant 1.280000e+02 : f32
    %12 = vector.broadcast %cst_10 : f32 to vector<64x1xf32>
    %13 = arith.divf %11, %12 : vector<64x1xf32>
    %14 = arith.mulf %8, %8 : vector<64x1xf32>
    %15 = arith.subf %13, %14 : vector<64x1xf32>
    %cst_11 = arith.constant 9.99999974E-6 : f32
    %16 = vector.broadcast %cst_11 : f32 to vector<64x1xf32>
    %17 = arith.addf %15, %16 : vector<64x1xf32>
    %18 = math.rsqrt %17 : vector<64x1xf32>
    %19 = vector.broadcast %8 : vector<64x1xf32> to vector<64x128xf32>
    %20 = arith.subf %4, %19 : vector<64x128xf32>
    %21 = vector.broadcast %18 : vector<64x1xf32> to vector<64x128xf32>
    %22 = arith.mulf %20, %21 : vector<64x128xf32>
    %23 = vector.broadcast %0 : vector<1x128xf32> to vector<64x128xf32>
    %24 = arith.mulf %22, %23 : vector<64x128xf32>
    %25 = vector.broadcast %1 : vector<1x128xf32> to vector<64x128xf32>
    %26 = arith.addf %24, %25 : vector<64x128xf32>
    %c0_12 = arith.constant 0 : index
    %c0_13 = arith.constant 0 : index
    %c0_14 = arith.constant 0 : index
    %27 = vector.load %arg5[%c0_12, %c0_13, %c0_14] : memref<2x85x128xf32, #tpu.memory_space<vmem>>, vector<1x64x128xf32>
    %28 = vector.shape_cast %27 : vector<1x64x128xf32> to vector<64x128xf32>
    %29 = vector.shape_cast %26 : vector<64x128xf32> to vector<1x64x128xf32>
    tpu.vector_store %arg5[%c0_12, %c0_13, %c0_14], %29 {strides = array<i32>} : memref<2x85x128xf32, #tpu.memory_space<vmem>>, vector<1x64x128xf32>,
    %30 = arith.truncf %4 : vector<64x128xf32> to vector<64x128xbf16>
    %cst_15 = arith.constant dense<0.000000e+00> : vector<21x128xf32>
    %31 = tpu.matmul %2, %30, %cst_15 {dimension_numbers = #tpu.dot_dimension_numbers<[1], [0], [0], [1], [0, 0, 1, 1], [], []>} : vector<21x64xbf16>, vector<64x128xbf16>, vector<21x128xf32> -> vector<21x128xf32>
    %cst_16 = arith.constant dense<0.000000e+00> : vector<21xf32>
    %32 = vector.multi_reduction <add>, %31, %cst_16 [1] : vector<21x128xf32> to vector<21xf32>
    %33 = vector.shape_cast %32 : vector<21xf32> to vector<21x1xf32>
    %cst_17 = arith.constant 1.280000e+02 : f32
    %34 = vector.broadcast %cst_17 : f32 to vector<21x1xf32>
    %35 = arith.divf %33, %34 : vector<21x1xf32>
    %36 = arith.mulf %31, %31 : vector<21x128xf32>
    %cst_18 = arith.constant dense<0.000000e+00> : vector<21xf32>
    %37 = vector.multi_reduction <add>, %36, %cst_18 [1] : vector<21x128xf32> to vector<21xf32>
    %38 = vector.shape_cast %37 : vector<21xf32> to vector<21x1xf32>
    %cst_19 = arith.constant 1.280000e+02 : f32
    %39 = vector.broadcast %cst_19 : f32 to vector<21x1xf32>
    %40 = arith.divf %38, %39 : vector<21x1xf32>
    %41 = arith.mulf %35, %35 : vector<21x1xf32>
    %42 = arith.subf %40, %41 : vector<21x1xf32>
    %cst_20 = arith.constant 9.99999974E-6 : f32
    %43 = vector.broadcast %cst_20 : f32 to vector<21x1xf32>
    %44 = arith.addf %42, %43 : vector<21x1xf32>
    %45 = math.rsqrt %44 : vector<21x1xf32>
    %46 = vector.broadcast %35 : vector<21x1xf32> to vector<21x128xf32>
    %47 = arith.subf %31, %46 : vector<21x128xf32>
    %48 = vector.broadcast %45 : vector<21x1xf32> to vector<21x128xf32>
    %49 = arith.mulf %47, %48 : vector<21x128xf32>
    %50 = vector.broadcast %0 : vector<1x128xf32> to vector<21x128xf32>
    %51 = arith.mulf %49, %50 : vector<21x128xf32>
    %52 = vector.broadcast %1 : vector<1x128xf32> to vector<21x128xf32>
    %53 = arith.addf %51, %52 : vector<21x128xf32>
    %c0_21 = arith.constant 0 : index
    %c64 = arith.constant 64 : index
    %c0_22 = arith.constant 0 : index
    %54 = vector.load %arg5[%c0_21, %c64, %c0_22] : memref<2x85x128xf32, #tpu.memory_space<vmem>>, vector<1x21x128xf32>
    %55 = vector.shape_cast %54 : vector<1x21x128xf32> to vector<21x128xf32>
    %56 = vector.shape_cast %53 : vector<21x128xf32> to vector<1x21x128xf32>
    tpu.vector_store %arg5[%c0_21, %c64, %c0_22], %56 {strides = array<i32>} : memref<2x85x128xf32, #tpu.memory_space<vmem>>, vector<1x21x128xf32>,
    %c1 = arith.constant 1 : index
    %c0_23 = arith.constant 0 : index
    %c0_24 = arith.constant 0 : index
    %57 = vector.load %arg2[%c1, %c0_23, %c0_24] : memref<2x64x128xf32, #tpu.memory_space<vmem>>, vector<1x64x128xf32>
    %58 = vector.shape_cast %57 : vector<1x64x128xf32> to vector<64x128xf32>
    %cst_25 = arith.constant dense<0.000000e+00> : vector<64xf32>
    %59 = vector.multi_reduction <add>, %58, %cst_25 [1] : vector<64x128xf32> to vector<64xf32>
    %60 = vector.shape_cast %59 : vector<64xf32> to vector<64x1xf32>
    %cst_26 = arith.constant 1.280000e+02 : f32
    %61 = vector.broadcast %cst_26 : f32 to vector<64x1xf32>
    %62 = arith.divf %60, %61 : vector<64x1xf32>
    %63 = arith.mulf %58, %58 : vector<64x128xf32>
    %cst_27 = arith.constant dense<0.000000e+00> : vector<64xf32>
    %64 = vector.multi_reduction <add>, %63, %cst_27 [1] : vector<64x128xf32> to vector<64xf32>
    %65 = vector.shape_cast %64 : vector<64xf32> to vector<64x1xf32>
    %cst_28 = arith.constant 1.280000e+02 : f32
    %66 = vector.broadcast %cst_28 : f32 to vector<64x1xf32>
    %67 = arith.divf %65, %66 : vector<64x1xf32>
    %68 = arith.mulf %62, %62 : vector<64x1xf32>
    %69 = arith.subf %67, %68 : vector<64x1xf32>
    %cst_29 = arith.constant 9.99999974E-6 : f32
    %70 = vector.broadcast %cst_29 : f32 to vector<64x1xf32>
    %71 = arith.addf %69, %70 : vector<64x1xf32>
    %72 = math.rsqrt %71 : vector<64x1xf32>
    %73 = vector.broadcast %62 : vector<64x1xf32> to vector<64x128xf32>
    %74 = arith.subf %58, %73 : vector<64x128xf32>
    %75 = vector.broadcast %72 : vector<64x1xf32> to vector<64x128xf32>
    %76 = arith.mulf %74, %75 : vector<64x128xf32>
    %77 = vector.broadcast %0 : vector<1x128xf32> to vector<64x128xf32>
    %78 = arith.mulf %76, %77 : vector<64x128xf32>
    %79 = vector.broadcast %1 : vector<1x128xf32> to vector<64x128xf32>
    %80 = arith.addf %78, %79 : vector<64x128xf32>
    %c1_30 = arith.constant 1 : index
    %c0_31 = arith.constant 0 : index
    %c0_32 = arith.constant 0 : index
    %81 = vector.load %arg5[%c1_30, %c0_31, %c0_32] : memref<2x85x128xf32, #tpu.memory_space<vmem>>, vector<1x64x128xf32>
    %82 = vector.shape_cast %81 : vector<1x64x128xf32> to vector<64x128xf32>
    %83 = vector.shape_cast %80 : vector<64x128xf32> to vector<1x64x128xf32>
    tpu.vector_store %arg5[%c1_30, %c0_31, %c0_32], %83 {strides = array<i32>} : memref<2x85x128xf32, #tpu.memory_space<vmem>>, vector<1x64x128xf32>,
    %84 = arith.truncf %58 : vector<64x128xf32> to vector<64x128xbf16>
    %cst_33 = arith.constant dense<0.000000e+00> : vector<21x128xf32>
    %85 = tpu.matmul %2, %84, %cst_33 {dimension_numbers = #tpu.dot_dimension_numbers<[1], [0], [0], [1], [0, 0, 1, 1], [], []>} : vector<21x64xbf16>, vector<64x128xbf16>, vector<21x128xf32> -> vector<21x128xf32>
    %cst_34 = arith.constant dense<0.000000e+00> : vector<21xf32>
    %86 = vector.multi_reduction <add>, %85, %cst_34 [1] : vector<21x128xf32> to vector<21xf32>
    %87 = vector.shape_cast %86 : vector<21xf32> to vector<21x1xf32>
    %cst_35 = arith.constant 1.280000e+02 : f32
    %88 = vector.broadcast %cst_35 : f32 to vector<21x1xf32>
    %89 = arith.divf %87, %88 : vector<21x1xf32>
    %90 = arith.mulf %85, %85 : vector<21x128xf32>
    %cst_36 = arith.constant dense<0.000000e+00> : vector<21xf32>
    %91 = vector.multi_reduction <add>, %90, %cst_36 [1] : vector<21x128xf32> to vector<21xf32>
    %92 = vector.shape_cast %91 : vector<21xf32> to vector<21x1xf32>
    %cst_37 = arith.constant 1.280000e+02 : f32
    %93 = vector.broadcast %cst_37 : f32 to vector<21x1xf32>
    %94 = arith.divf %92, %93 : vector<21x1xf32>
    %95 = arith.mulf %89, %89 : vector<21x1xf32>
    %96 = arith.subf %94, %95 : vector<21x1xf32>
    %cst_38 = arith.constant 9.99999974E-6 : f32
    %97 = vector.broadcast %cst_38 : f32 to vector<21x1xf32>
    %98 = arith.addf %96, %97 : vector<21x1xf32>
    %99 = math.rsqrt %98 : vector<21x1xf32>
    %100 = vector.broadcast %89 : vector<21x1xf32> to vector<21x128xf32>
    %101 = arith.subf %85, %100 : vector<21x128xf32>
    %102 = vector.broadcast %99 : vector<21x1xf32> to vector<21x128xf32>
    %103 = arith.mulf %101, %102 : vector<21x128xf32>
    %104 = vector.broadcast %0 : vector<1x128xf32> to vector<21x128xf32>
    %105 = arith.mulf %103, %104 : vector<21x128xf32>
    %106 = vector.broadcast %1 : vector<1x128xf32> to vector<21x128xf32>
    %107 = arith.addf %105, %106 : vector<21x128xf32>
    %c1_39 = arith.constant 1 : index
    %c64_40 = arith.constant 64 : index
    %c0_41 = arith.constant 0 : index
    %108 = vector.load %arg5[%c1_39, %c64_40, %c0_41] : memref<2x85x128xf32, #tpu.memory_space<vmem>>, vector<1x21x128xf32>
    %109 = vector.shape_cast %108 : vector<1x21x128xf32> to vector<21x128xf32>
    %110 = vector.shape_cast %107 : vector<21x128xf32> to vector<1x21x128xf32>
    tpu.vector_store %arg5[%c1_39, %c64_40, %c0_41], %110 {strides = array<i32>} : memref<2x85x128xf32, #tpu.memory_space<vmem>>, vector<1x21x128xf32>,
    return
  }
  func.func @transform_0(%arg0: i32) -> (i32, i32) {
    %c0_i32 = arith.constant 0 : i32
    %c0_i32_0 = arith.constant 0 : i32
    %c0_i32_1 = arith.constant 0 : i32
    return %c0_i32, %c0_i32_0 : i32, i32
  }
  func.func @transform_1(%arg0: i32) -> (i32, i32, i32) {
    %c0_i32 = arith.constant 0 : i32
    %c0_i32_0 = arith.constant 0 : i32
    %c0_i32_1 = arith.constant 0 : i32
    return %arg0, %c0_i32, %c0_i32_0 : i32, i32, i32
  }
  func.func @transform_2(%arg0: i32) -> (i32, i32) {
    %c0_i32 = arith.constant 0 : i32
    %c0_i32_0 = arith.constant 0 : i32
    %c0_i32_1 = arith.constant 0 : i32
    return %c0_i32, %c0_i32_0 : i32, i32
  }
  func.func @transform_3(%arg0: i32) -> (i32, i32) {
    %c0_i32 = arith.constant 0 : i32
    %c0_i32_0 = arith.constant 0 : i32
    %c0_i32_1 = arith.constant 0 : i32
    return %c0_i32, %c0_i32_0 : i32, i32
  }
  func.func @transform_4(%arg0: i32) -> (i32, i32, i32) {
    %c0_i32 = arith.constant 0 : i32
    %c0_i32_0 = arith.constant 0 : i32
    %c0_i32_1 = arith.constant 0 : i32
    return %arg0, %c0_i32, %c0_i32_0 : i32, i32, i32
  }
}

module attributes {stable_mosaic.version = 11 : i64} {
  func.func @_avgpool_construct_kernel(%arg0: i32, %arg1: memref<21x64xbf16, #tpu.memory_space<vmem>>, %arg2: memref<2x64x128xf32, #tpu.memory_space<vmem>>, %arg3: memref<1x128xf32, #tpu.memory_space<vmem>>, %arg4: memref<1x128xf32, #tpu.memory_space<vmem>>, %arg5: memref<2x85x128xf32, #tpu.memory_space<vmem>>) attributes {dimension_semantics = [#tpu.dimension_semantics<parallel>], iteration_bounds = array<i64: 1>, scalar_prefetch = 0 : i64, scratch_operands = 0 : i64, tpu.core_type = #tpu.core_type<tc>, window_params = [{pipeline_mode = #tpu.pipeline_mode<synchronous>, transform_indices = @transform_0, window_bounds = array<i64: 21, 64>}, {transform_indices = @transform_1, window_bounds = array<i64: 2, 64, 128>}, {pipeline_mode = #tpu.pipeline_mode<synchronous>, transform_indices = @transform_2, window_bounds = array<i64: 1, 128>}, {pipeline_mode = #tpu.pipeline_mode<synchronous>, transform_indices = @transform_3, window_bounds = array<i64: 1, 128>}, {transform_indices = @transform_4, window_bounds = array<i64: 2, 85, 128>}]} {
    %c0 = arith.constant 0 : index
    %c0_0 = arith.constant 0 : index
    %0 = vector.load %arg3[%c0, %c0_0] : memref<1x128xf32, #tpu.memory_space<vmem>>, vector<1x128xf32>
    %c0_1 = arith.constant 0 : index
    %c0_2 = arith.constant 0 : index
    %1 = vector.load %arg4[%c0_1, %c0_2] : memref<1x128xf32, #tpu.memory_space<vmem>>, vector<1x128xf32>
    %c0_3 = arith.constant 0 : index
    %c0_4 = arith.constant 0 : index
    %2 = vector.load %arg1[%c0_3, %c0_4] : memref<21x64xbf16, #tpu.memory_space<vmem>>, vector<21x64xbf16>
    %c0_5 = arith.constant 0 : index
    %c0_6 = arith.constant 0 : index
    %c0_7 = arith.constant 0 : index
    %3 = vector.load %arg2[%c0_5, %c0_6, %c0_7] : memref<2x64x128xf32, #tpu.memory_space<vmem>>, vector<1x64x128xf32>
    %4 = vector.shape_cast %3 : vector<1x64x128xf32> to vector<64x128xf32>
    %cst = arith.constant dense<0.000000e+00> : vector<64xf32>
    %5 = vector.multi_reduction <add>, %4, %cst [1] : vector<64x128xf32> to vector<64xf32>
    %6 = vector.shape_cast %5 : vector<64xf32> to vector<64x1xf32>
    %cst_8 = arith.constant 1.280000e+02 : f32
    %7 = vector.broadcast %cst_8 : f32 to vector<64x1xf32>
    %8 = arith.divf %6, %7 : vector<64x1xf32>
    %9 = arith.mulf %4, %4 : vector<64x128xf32>
    %cst_9 = arith.constant dense<0.000000e+00> : vector<64xf32>
    %10 = vector.multi_reduction <add>, %9, %cst_9 [1] : vector<64x128xf32> to vector<64xf32>
    %11 = vector.shape_cast %10 : vector<64xf32> to vector<64x1xf32>
    %cst_10 = arith.constant 1.280000e+02 : f32
    %12 = vector.broadcast %cst_10 : f32 to vector<64x1xf32>
    %13 = arith.divf %11, %12 : vector<64x1xf32>
    %14 = arith.mulf %8, %8 : vector<64x1xf32>
    %15 = arith.subf %13, %14 : vector<64x1xf32>
    %cst_11 = arith.constant 9.99999974E-6 : f32
    %16 = vector.broadcast %cst_11 : f32 to vector<64x1xf32>
    %17 = arith.addf %15, %16 : vector<64x1xf32>
    %18 = math.rsqrt %17 : vector<64x1xf32>
    %19 = vector.broadcast %8 : vector<64x1xf32> to vector<64x128xf32>
    %20 = arith.subf %4, %19 : vector<64x128xf32>
    %21 = vector.broadcast %18 : vector<64x1xf32> to vector<64x128xf32>
    %22 = arith.mulf %20, %21 : vector<64x128xf32>
    %23 = vector.broadcast %0 : vector<1x128xf32> to vector<64x128xf32>
    %24 = arith.mulf %22, %23 : vector<64x128xf32>
    %25 = vector.broadcast %1 : vector<1x128xf32> to vector<64x128xf32>
    %26 = arith.addf %24, %25 : vector<64x128xf32>
    %c0_12 = arith.constant 0 : index
    %c0_13 = arith.constant 0 : index
    %c0_14 = arith.constant 0 : index
    %27 = vector.load %arg5[%c0_12, %c0_13, %c0_14] : memref<2x85x128xf32, #tpu.memory_space<vmem>>, vector<1x64x128xf32>
    %28 = vector.shape_cast %27 : vector<1x64x128xf32> to vector<64x128xf32>
    %29 = vector.shape_cast %26 : vector<64x128xf32> to vector<1x64x128xf32>
    tpu.vector_store %arg5[%c0_12, %c0_13, %c0_14], %29 {strides = array<i32>} : memref<2x85x128xf32, #tpu.memory_space<vmem>>, vector<1x64x128xf32>,
    %30 = arith.truncf %4 : vector<64x128xf32> to vector<64x128xbf16>
    %cst_15 = arith.constant dense<0.000000e+00> : vector<21x128xf32>
    %31 = tpu.matmul %2, %30, %cst_15 {dimension_numbers = #tpu.dot_dimension_numbers<[1], [0], [0], [1], [0, 0, 1, 1], [], []>} : vector<21x64xbf16>, vector<64x128xbf16>, vector<21x128xf32> -> vector<21x128xf32>
    %cst_16 = arith.constant dense<0.000000e+00> : vector<21xf32>
    %32 = vector.multi_reduction <add>, %31, %cst_16 [1] : vector<21x128xf32> to vector<21xf32>
    %33 = vector.shape_cast %32 : vector<21xf32> to vector<21x1xf32>
    %cst_17 = arith.constant 1.280000e+02 : f32
    %34 = vector.broadcast %cst_17 : f32 to vector<21x1xf32>
    %35 = arith.divf %33, %34 : vector<21x1xf32>
    %36 = arith.mulf %31, %31 : vector<21x128xf32>
    %cst_18 = arith.constant dense<0.000000e+00> : vector<21xf32>
    %37 = vector.multi_reduction <add>, %36, %cst_18 [1] : vector<21x128xf32> to vector<21xf32>
    %38 = vector.shape_cast %37 : vector<21xf32> to vector<21x1xf32>
    %cst_19 = arith.constant 1.280000e+02 : f32
    %39 = vector.broadcast %cst_19 : f32 to vector<21x1xf32>
    %40 = arith.divf %38, %39 : vector<21x1xf32>
    %41 = arith.mulf %35, %35 : vector<21x1xf32>
    %42 = arith.subf %40, %41 : vector<21x1xf32>
    %cst_20 = arith.constant 9.99999974E-6 : f32
    %43 = vector.broadcast %cst_20 : f32 to vector<21x1xf32>
    %44 = arith.addf %42, %43 : vector<21x1xf32>
    %45 = math.rsqrt %44 : vector<21x1xf32>
    %46 = vector.broadcast %35 : vector<21x1xf32> to vector<21x128xf32>
    %47 = arith.subf %31, %46 : vector<21x128xf32>
    %48 = vector.broadcast %45 : vector<21x1xf32> to vector<21x128xf32>
    %49 = arith.mulf %47, %48 : vector<21x128xf32>
    %50 = vector.broadcast %0 : vector<1x128xf32> to vector<21x128xf32>
    %51 = arith.mulf %49, %50 : vector<21x128xf32>
    %52 = vector.broadcast %1 : vector<1x128xf32> to vector<21x128xf32>
    %53 = arith.addf %51, %52 : vector<21x128xf32>
    %c0_21 = arith.constant 0 : index
    %c64 = arith.constant 64 : index
    %c0_22 = arith.constant 0 : index
    %54 = vector.load %arg5[%c0_21, %c64, %c0_22] : memref<2x85x128xf32, #tpu.memory_space<vmem>>, vector<1x21x128xf32>
    %55 = vector.shape_cast %54 : vector<1x21x128xf32> to vector<21x128xf32>
    %56 = vector.shape_cast %53 : vector<21x128xf32> to vector<1x21x128xf32>
    tpu.vector_store %arg5[%c0_21, %c64, %c0_22], %56 {strides = array<i32>} : memref<2x85x128xf32, #tpu.memory_space<vmem>>, vector<1x21x128xf32>,
    %c1 = arith.constant 1 : index
    %c0_23 = arith.constant 0 : index
    %c0_24 = arith.constant 0 : index
    %57 = vector.load %arg2[%c1, %c0_23, %c0_24] : memref<2x64x128xf32, #tpu.memory_space<vmem>>, vector<1x64x128xf32>
    %58 = vector.shape_cast %57 : vector<1x64x128xf32> to vector<64x128xf32>
    %cst_25 = arith.constant dense<0.000000e+00> : vector<64xf32>
    %59 = vector.multi_reduction <add>, %58, %cst_25 [1] : vector<64x128xf32> to vector<64xf32>
    %60 = vector.shape_cast %59 : vector<64xf32> to vector<64x1xf32>
    %cst_26 = arith.constant 1.280000e+02 : f32
    %61 = vector.broadcast %cst_26 : f32 to vector<64x1xf32>
    %62 = arith.divf %60, %61 : vector<64x1xf32>
    %63 = arith.mulf %58, %58 : vector<64x128xf32>
    %cst_27 = arith.constant dense<0.000000e+00> : vector<64xf32>
    %64 = vector.multi_reduction <add>, %63, %cst_27 [1] : vector<64x128xf32> to vector<64xf32>
    %65 = vector.shape_cast %64 : vector<64xf32> to vector<64x1xf32>
    %cst_28 = arith.constant 1.280000e+02 : f32
    %66 = vector.broadcast %cst_28 : f32 to vector<64x1xf32>
    %67 = arith.divf %65, %66 : vector<64x1xf32>
    %68 = arith.mulf %62, %62 : vector<64x1xf32>
    %69 = arith.subf %67, %68 : vector<64x1xf32>
    %cst_29 = arith.constant 9.99999974E-6 : f32
    %70 = vector.broadcast %cst_29 : f32 to vector<64x1xf32>
    %71 = arith.addf %69, %70 : vector<64x1xf32>
    %72 = math.rsqrt %71 : vector<64x1xf32>
    %73 = vector.broadcast %62 : vector<64x1xf32> to vector<64x128xf32>
    %74 = arith.subf %58, %73 : vector<64x128xf32>
    %75 = vector.broadcast %72 : vector<64x1xf32> to vector<64x128xf32>
    %76 = arith.mulf %74, %75 : vector<64x128xf32>
    %77 = vector.broadcast %0 : vector<1x128xf32> to vector<64x128xf32>
    %78 = arith.mulf %76, %77 : vector<64x128xf32>
    %79 = vector.broadcast %1 : vector<1x128xf32> to vector<64x128xf32>
    %80 = arith.addf %78, %79 : vector<64x128xf32>
    %c1_30 = arith.constant 1 : index
    %c0_31 = arith.constant 0 : index
    %c0_32 = arith.constant 0 : index
    %81 = vector.load %arg5[%c1_30, %c0_31, %c0_32] : memref<2x85x128xf32, #tpu.memory_space<vmem>>, vector<1x64x128xf32>
    %82 = vector.shape_cast %81 : vector<1x64x128xf32> to vector<64x128xf32>
    %83 = vector.shape_cast %80 : vector<64x128xf32> to vector<1x64x128xf32>
    tpu.vector_store %arg5[%c1_30, %c0_31, %c0_32], %83 {strides = array<i32>} : memref<2x85x128xf32, #tpu.memory_space<vmem>>, vector<1x64x128xf32>,
    %84 = arith.truncf %58 : vector<64x128xf32> to vector<64x128xbf16>
    %cst_33 = arith.constant dense<0.000000e+00> : vector<21x128xf32>
    %85 = tpu.matmul %2, %84, %cst_33 {dimension_numbers = #tpu.dot_dimension_numbers<[1], [0], [0], [1], [0, 0, 1, 1], [], []>} : vector<21x64xbf16>, vector<64x128xbf16>, vector<21x128xf32> -> vector<21x128xf32>
    %cst_34 = arith.constant dense<0.000000e+00> : vector<21xf32>
    %86 = vector.multi_reduction <add>, %85, %cst_34 [1] : vector<21x128xf32> to vector<21xf32>
    %87 = vector.shape_cast %86 : vector<21xf32> to vector<21x1xf32>
    %cst_35 = arith.constant 1.280000e+02 : f32
    %88 = vector.broadcast %cst_35 : f32 to vector<21x1xf32>
    %89 = arith.divf %87, %88 : vector<21x1xf32>
    %90 = arith.mulf %85, %85 : vector<21x128xf32>
    %cst_36 = arith.constant dense<0.000000e+00> : vector<21xf32>
    %91 = vector.multi_reduction <add>, %90, %cst_36 [1] : vector<21x128xf32> to vector<21xf32>
    %92 = vector.shape_cast %91 : vector<21xf32> to vector<21x1xf32>
    %cst_37 = arith.constant 1.280000e+02 : f32
    %93 = vector.broadcast %cst_37 : f32 to vector<21x1xf32>
    %94 = arith.divf %92, %93 : vector<21x1xf32>
    %95 = arith.mulf %89, %89 : vector<21x1xf32>
    %96 = arith.subf %94, %95 : vector<21x1xf32>
    %cst_38 = arith.constant 9.99999974E-6 : f32
    %97 = vector.broadcast %cst_38 : f32 to vector<21x1xf32>
    %98 = arith.addf %96, %97 : vector<21x1xf32>
    %99 = math.rsqrt %98 : vector<21x1xf32>
    %100 = vector.broadcast %89 : vector<21x1xf32> to vector<21x128xf32>
    %101 = arith.subf %85, %100 : vector<21x128xf32>
    %102 = vector.broadcast %99 : vector<21x1xf32> to vector<21x128xf32>
    %103 = arith.mulf %101, %102 : vector<21x128xf32>
    %104 = vector.broadcast %0 : vector<1x128xf32> to vector<21x128xf32>
    %105 = arith.mulf %103, %104 : vector<21x128xf32>
    %106 = vector.broadcast %1 : vector<1x128xf32> to vector<21x128xf32>
    %107 = arith.addf %105, %106 : vector<21x128xf32>
    %c1_39 = arith.constant 1 : index
    %c64_40 = arith.constant 64 : index
    %c0_41 = arith.constant 0 : index
    %108 = vector.load %arg5[%c1_39, %c64_40, %c0_41] : memref<2x85x128xf32, #tpu.memory_space<vmem>>, vector<1x21x128xf32>
    %109 = vector.shape_cast %108 : vector<1x21x128xf32> to vector<21x128xf32>
    %110 = vector.shape_cast %107 : vector<21x128xf32> to vector<1x21x128xf32>
    tpu.vector_store %arg5[%c1_39, %c64_40, %c0_41], %110 {strides = array<i32>} : memref<2x85x128xf32, #tpu.memory_space<vmem>>, vector<1x21x128xf32>,
    return
  }
  func.func @transform_0(%arg0: i32) -> (i32, i32) {
    %c0_i32 = arith.constant 0 : i32
    %c0_i32_0 = arith.constant 0 : i32
    %c0_i32_1 = arith.constant 0 : i32
    return %c0_i32, %c0_i32_0 : i32, i32
  }
  func.func @transform_1(%arg0: i32) -> (i32, i32, i32) {
    %c0_i32 = arith.constant 0 : i32
    %c0_i32_0 = arith.constant 0 : i32
    %c0_i32_1 = arith.constant 0 : i32
    return %arg0, %c0_i32, %c0_i32_0 : i32, i32, i32
  }
  func.func @transform_2(%arg0: i32) -> (i32, i32) {
    %c0_i32 = arith.constant 0 : i32
    %c0_i32_0 = arith.constant 0 : i32
    %c0_i32_1 = arith.constant 0 : i32
    return %c0_i32, %c0_i32_0 : i32, i32
  }
  func.func @transform_3(%arg0: i32) -> (i32, i32) {
    %c0_i32 = arith.constant 0 : i32
    %c0_i32_0 = arith.constant 0 : i32
    %c0_i32_1 = arith.constant 0 : i32
    return %c0_i32, %c0_i32_0 : i32, i32
  }
  func.func @transform_4(%arg0: i32) -> (i32, i32, i32) {
    %c0_i32 = arith.constant 0 : i32
    %c0_i32_0 = arith.constant 0 : i32
    %c0_i32_1 = arith.constant 0 : i32
    return %arg0, %c0_i32, %c0_i32_0 : i32, i32, i32
  }
}

</mosaic_0001>

<bundles_post_ra>
// kernel: tpu_custom_call.1
= control target key start
LH: loop header
LB: loop body
LE: loop exit
PB: predicated region body
PF: predicated region fallthrough
CT: control target
= control target key end

     0   :  { %9 = vsyncpa [#allocation3], 0  ;;  %s1584_s0 = inlined_call_operand.hbm [shape: bf16[21,64], index: 0, kind: input, shape index: {}]   ;;  %s1585_s1 = inlined_call_operand.hbm [shape: f32[2,64,128], index: 1, kind: input, shape index: {}]   ;;  %s1586_s2 = inlined_call_operand.vmem [shape: f32[1,128], index: 2, kind: input, shape index: {}]   ;;  %s1587_s3 = inlined_call_operand.vmem [shape: f32[1,128], index: 3, kind: input, shape index: {}]   ;;  %s1588_s4 = inlined_call_operand.vmem [shape: f32[2,85,128], index: 4, kind: output, shape index: {}]  }
   0x1   :  { %s15_s17 = sshll.u32 %s1584_s0, 4  ;;  %s16_s17 = int_to_ptr.hbm [resolvable:$true] %s15_s17 }
   0x2   :  { %10 = vsyncpa [#allocation5], 0  ;;  %s841_s18 = smov [#allocation2]   ;;  %s28_s22 = sshll.u32 %s1585_s1, 4  ;;  %s29_s22 = int_to_ptr.hbm [resolvable:$true] %s28_s22 }
   0x3   :  { %s17_s19 = sshll.u32 %s841_s18, 4  ;;  %s842_s23 = smov 64   ;;  %s18_s19 = int_to_ptr.vmem [resolvable:$true] %s17_s19 }
   0x4   :  { %s843_s24 = smov 4   ;;  %s844_s25 = smov [#allocation4]  }
   0x5   :  { %23 = dma.hbm_to_vmem [thread:$0]  %s16_s17, 192, %s18_s19, [#allocation3], %s842_s23, %s842_s23, %s843_s24  }
   0x6   :  { %s30_s26 = sshll.u32 %s844_s25, 4  ;;  %s845_s27 = smov 128   ;;  %s31_s26 = int_to_ptr.vmem [resolvable:$true] %s30_s26 }
   0x7   :  { %s846_s28 = smov 8  }
   0x8   :  { %36 = dma.hbm_to_vmem [thread:$0]  %s29_s22, 2048, %s31_s26, [#allocation5], %s845_s27, %s845_s27, %s846_s28  }
   0x9   :  { %837 = dma.done.wait [#allocation3], 192  }
   0xa   :  { %838 = vsyncadd [#allocation3], 4294967104 }
   0xb   :  { %839 = dma.done.wait [#allocation5], 2048  }
   0xc   :  { %840 = vsyncadd [#allocation5], 4294965248  ;;  %v879_v0 = vld [vmem:[#allocation4 + $0x30] sm:$0xff]  ;;  %v881_v1 = vld [vmem:[#allocation4 + $0x38] sm:$0xff]  ;;  %vm288_vm0 = vcmask 523264   ;;  %v847_v44 = vmov 128.0  }
   0xd   :  { %v883_v2 = vld [vmem:[#allocation4 + $0x70] sm:$0xff]  ;;  %v279_v3 = vpack.c.bf16 %v881_v1, %v879_v0  ;;  %v887_v4 = vld [vmem:[#allocation4 + $0x78] sm:$0xff]  ;;  %v889_v5 = vld [vmem:[#allocation4 + $0x20] sm:$0xff]  ;;  %v100_v32 = vmul.f32 %v879_v0, %v879_v0  ;;  %v101_v35 = vmul.f32 %v881_v1, %v881_v1  ;;  %743 = vrcp.f32 %v847_v44 }
   0xe   :  { %v891_v6 = vld [vmem:[#allocation4 + $0x28] sm:$0xff]  ;;  %v604_v7 = vpack.c.bf16 %v887_v4, %v883_v2  ;;  %v895_v8 = vld [vmem:[#allocation4 + $0x60] sm:$0xff]  ;;  %71 = vadd.xlane.f32.xlu2 %v889_v5  ;;  %v904_v12 = vld [vmem:[#allocation4 + $0x10] sm:$0xff]  ;;  %v98_v33 = vmul.f32 %v889_v5, %v889_v5  ;;  %v431_v41 = vmul.f32 %v887_v4, %v887_v4  ;;  %v430_v43 = vmul.f32 %v883_v2, %v883_v2 }
   0xf   :  { %v897_v9 = vld [vmem:[#allocation4 + $0x68] sm:$0xff]  ;;  %299 = vmatpush.bf16.msra.mxu0 %v279_v3  ;;  %726 = vmatpush.bf16.msra.mxu2 %v279_v3  ;;  %v278_v10 = vpack.c.bf16 %v891_v6, %v889_v5  ;;  %v906_v13 = vld [vmem:[#allocation4 + $0x18] sm:$0xff]  ;;  %v908_v14 = vld [vmem:[#allocation4] sm:$0xff]  ;;  %v96_v30 = vmul.f32 %v904_v12, %v904_v12  ;;  %v99_v34 = vmul.f32 %v891_v6, %v891_v6  ;;  %vm317_vm2 = vcmask 1044480  }
  0x10   :  { %609 = vmatpush.bf16.msra.mxu1 %v604_v7  ;;  %v603_v11 = vpack.c.bf16 %v897_v9, %v895_v8  ;;  %730 = vmatpush.bf16.msra.mxu3 %v604_v7  ;;  %v910_v15 = vld [vmem:[#allocation4 + $0x50] sm:$0xff]  ;;  %v912_v16 = vld [vmem:[#allocation4 + $0x58] sm:$0xff]  ;;  %v277_v17 = vpack.c.bf16 %v906_v13, %v904_v12  ;;  %v920_v20 = vld [vmem:[#allocation4 + $0x8] sm:$0xff]  ;;  %v94_v28 = vmul.f32 %v908_v14, %v908_v14 }
  0x11   :  { %67 = vadd.xlane.f32.xlu1 %v904_v12  ;;  %63 = vadd.xlane.f32.xlu0 %v908_v14  ;;  %v54_v18 = vld [vmem:[#allocation2 + $0x8] sm:$0x7]  ;;  %v602_v19 = vpack.c.bf16 %v912_v16, %v910_v15  ;;  %v922_v21 = vld [vmem:[#allocation4 + $0x40] sm:$0xff]  ;;  %v924_v22 = vld [vmem:[#allocation4 + $0x48] sm:$0xff]  ;;  %v276_v24 = vpack.c.bf16 %v920_v20, %v908_v14  ;;  %v97_v29 = vmul.f32 %v906_v13, %v906_v13 }
  0x12   :  { %v285_v23 = vunpack.c.l.b16 %v54_v18  ;;  %v601_v25 = vpack.c.bf16 %v924_v22, %v922_v21  ;;  %v725_v26 = vld [vmem:[#allocation2] sm:$0xff]  ;;  %v95_v31 = vmul.f32 %v920_v20, %v920_v20  ;;  %v425_v36 = vmul.f32 %v924_v22, %v924_v22 }
  0x13   :  { %300 = vmatpush.bf16.msra.mxu0 %v278_v10  ;;  %727 = vmatpush.bf16.msra.mxu2 %v278_v10  ;;  %v426_v37 = vmul.f32 %v910_v15, %v910_v15  ;;  %v428_v38 = vmul.f32 %v895_v8, %v895_v8  ;;  %v429_v39 = vmul.f32 %v897_v9, %v897_v9  ;;  %v744_v45 = vpop.eup %743 }
  0x14   :  { %610 = vmatpush.bf16.msra.mxu1 %v603_v11  ;;  %731 = vmatpush.bf16.msra.mxu3 %v603_v11  ;;  %v287_v27 = vpack.c.b16 %v285_v23, %v285_v23  ;;  %v424_v40 = vmul.f32 %v922_v21, %v922_v21  ;;  %v427_v42 = vmul.f32 %v912_v16, %v912_v16  ;;  %v80_v46 = vmul.f32 128.0, %v744_v45 }
  0x15   :  { %vm84_vm1 = vweird.f32 %v744_v45 }
  0x16   :  { %73 = vadd.xlane.f32.xlu2 %v891_v6  ;;  %v81_v47 = vsub.f32 1.0, %v80_v46 }
  0x17   :  { %301 = vmatpush.bf16.msra.mxu0 %v277_v17  ;;  %728 = vmatpush.bf16.msra.mxu2 %v277_v17 }
  0x18   :  { %611 = vmatpush.bf16.msra.mxu1 %v602_v19  ;;  %732 = vmatpush.bf16.msra.mxu3 %v602_v19  ;;  %v82_v49 = vmul.f32 %v744_v45, %v81_v47 }
  0x19   :  { %69 = vadd.xlane.f32.xlu1 %v906_v13  ;;  %65 = vadd.xlane.f32.xlu0 %v920_v20 }
  0x1a   :  { %v83_v52 = vadd.f32 %v744_v45, %v82_v49 }
  0x1b   :  { %302 = vmatpush.bf16.msra.mxu0 %v276_v24  ;;  %729 = vmatpush.bf16.msra.mxu2 %v276_v24 }
  0x1c   :  { %612 = vmatpush.bf16.msra.mxu1 %v601_v25  ;;  %733 = vmatpush.bf16.msra.mxu3 %v601_v25  ;;  %v975_v54 = vsel %vm84_vm1, %v744_v45, %v83_v52 }
  0x1e   :  { %710 = vmatmul.msk.bf16.vlgmr.msra.gmra.mxu0 %vm288_vm0, %v725_v26  ;;  %711 = vmatmul.msk.bf16.vlgmr.msra.gmra.mxu2 %vm288_vm0, %v287_v27 }
  0x1f   :  { %720 = vmatmul.msk.bf16.vlgmr.msra.gmra.mxu1 %vm288_vm0, %v725_v26  ;;  %721 = vmatmul.msk.bf16.vlgmr.msra.gmra.mxu3 %vm288_vm0, %v287_v27 }
  0x20   :  { %102 = vadd.xlane.f32.xlu2 %v94_v28 }
  0x21   :  { %77 = vadd.xlane.f32.xlu1 %v881_v1  ;;  %75 = vadd.xlane.f32.xlu0 %v879_v0 }
  0x28   :  { %108 = vadd.xlane.f32.xlu2 %v97_v29 }
  0x29   :  { %106 = vadd.xlane.f32.xlu1 %v96_v30  ;;  %104 = vadd.xlane.f32.xlu0 %v95_v31 }
  0x30   :  { %114 = vadd.xlane.f32.xlu2 %v100_v32 }
  0x31   :  { %110 = vadd.xlane.f32.xlu0 %v98_v33  ;;  %112 = vadd.xlane.f32.xlu1 %v99_v34 }
  0x38   :  { %400 = vadd.xlane.f32.xlu2 %v922_v21 }
  0x39   :  { %116 = vadd.xlane.f32.xlu0 %v101_v35  ;;  %404 = vadd.xlane.f32.xlu1 %v910_v15 }
  0x40   :  { %406 = vadd.xlane.f32.xlu2 %v912_v16 }
  0x41   :  { %402 = vadd.xlane.f32.xlu0 %v924_v22  ;;  %410 = vadd.xlane.f32.xlu1 %v897_v9 }
  0x48   :  { %412 = vadd.xlane.f32.xlu2 %v883_v2 }
  0x49   :  { %408 = vadd.xlane.f32.xlu0 %v895_v8  ;;  %434 = vadd.xlane.f32.xlu1 %v425_v36 }
  0x50   :  { %436 = vadd.xlane.f32.xlu2 %v426_v37 }
  0x51   :  { %414 = vadd.xlane.f32.xlu0 %v887_v4  ;;  %440 = vadd.xlane.f32.xlu1 %v428_v38 }
  0x58   :  { %442 = vadd.xlane.f32.xlu2 %v429_v39 }
  0x59   :  { %432 = vadd.xlane.f32.xlu0 %v424_v40  ;;  %446 = vadd.xlane.f32.xlu1 %v431_v41 }
  0x61   :  { %438 = vadd.xlane.f32.xlu0 %v427_v42 }
  0x69   :  { %444 = vadd.xlane.f32.xlu0 %v430_v43 }
  0x81   :  { %v72_v48 = vpop.xlane.xlu2 %71 }
  0x82   :  { %v1003_v27 = vmul.f32 %v975_v54, %v72_v48 }
  0x84   :  { %v68_v50 = vpop.xlane.xlu1 %67  ;;  %v64_v51 = vpop.xlane.xlu0 %63  ;;  %v130_v38 = vmul.f32 %v1003_v27, %v1003_v27 }
  0x85   :  { %v978_v57 = vmul.f32 %v975_v54, %v64_v51  ;;  %v987_v7 = vmul.f32 %v975_v54, %v68_v50 }
  0x87   :  { %v126_v58 = vmul.f32 %v978_v57, %v978_v57  ;;  %v128_v18 = vmul.f32 %v987_v7, %v987_v7  ;;  %v232_v52 = vsub.f32 %v904_v12, %v987_v7 }
  0x89   :  { %v74_v53 = vpop.xlane.xlu2 %73 }
  0x8a   :  { %v1011_v33 = vmul.f32 %v975_v54, %v74_v53  ;;  %v230_v53 = vsub.f32 %v908_v14, %v978_v57 }
  0x8c   :  { %v70_v55 = vpop.xlane.xlu1 %69  ;;  %v66_v56 = vpop.xlane.xlu0 %65  ;;  %v131_v47 = vmul.f32 %v1011_v33, %v1011_v33 }
  0x8d   :  { %v984_v63 = vmul.f32 %v975_v54, %v70_v55  ;;  %v990_v10 = vmul.f32 %v975_v54, %v66_v56 }
  0x8f   :  { %v129_v17 = vmul.f32 %v984_v63, %v984_v63  ;;  %v127_v24 = vmul.f32 %v990_v10, %v990_v10  ;;  %v231_v14 = vsub.f32 %v920_v20, %v990_v10 }
  0x93   :  { %v103_v59 = vpop.xlane.xlu2 %102 }
  0x94   :  { %v78_v60 = vpop.xlane.xlu1 %77  ;;  %v76_v61 = vpop.xlane.xlu0 %75  ;;  %v118_v62 = vmul.f32 %v103_v59, %v975_v54 }
  0x95   :  { %v1007_v30 = vmul.f32 %v975_v54, %v76_v61  ;;  %v1038_v48 = vmul.f32 %v975_v54, %v78_v60  ;;  %v233_v61 = vsub.f32 %v906_v13, %v984_v63 }
  0x96   :  { %v134_v3 = vsub.f32 %v118_v62, %v126_v58 }
  0x97   :  { %v132_v43 = vmul.f32 %v1007_v30, %v1007_v30 }
  0x98   :  { %v142_v11 = vadd.f32 1e-05, %v134_v3  ;;  %v1061_v3 = vmul.f32 %v1038_v48, %v1038_v48 }
  0x9a   :  { %745 = vrsqrt.f32 %v142_v11  ;;  %vm156_vm3 = vweird.f32 %v142_v11 }
  0x9b   :  { %v996_v19 = vpop.f32.mrf.mxu0  ;;  %v109_v23 = vpop.xlane.xlu2 %108 }
  0x9c   :  { %313 = vadd.xlane.f32.xlu1 %v996_v19  ;;  %v107_v25 = vpop.xlane.xlu1 %106  ;;  %v121_v26 = vmul.f32 %v109_v23, %v975_v54  ;;  %v105_v29 = vpop.xlane.xlu0 %104 }
  0x9d   :  { %v120_v28 = vmul.f32 %v107_v25, %v975_v54  ;;  %v119_v31 = vmul.f32 %v105_v29, %v975_v54  ;;  %v1019_v39 = vpop.f32.mrf.mxu1 }
  0x9e   :  { %v137_v32 = vsub.f32 %v121_v26, %v129_v17  ;;  %v324_v26 = vmul.f32 %v996_v19, %v996_v19 }
  0x9f   :  { %v136_v34 = vsub.f32 %v120_v28, %v128_v18  ;;  %v135_v36 = vsub.f32 %v119_v31, %v127_v24 }
  0xa0   :  { %v1013_v35 = vpop.eup %745  ;;  %v1015_v37 = vadd.f32 1e-05, %v137_v32 }
  0xa1   :  { %v1021_v40 = vpop.f32.mrf.mxu2  ;;  %v151_v41 = vmul.f32 %v1013_v35, %v142_v11  ;;  %v1024_v42 = vadd.f32 1e-05, %v136_v34  ;;  %v1032_v46 = vadd.f32 1e-05, %v135_v36  ;;  %vm157_vm4 = vweird.f32 %v1013_v35 }
  0xa2   :  { %v318_v44 = vsel %vm317_vm2, %v1021_v40, 0.0  ;;  %v1030_v45 = vpop.f32.mrf.mxu3  ;;  %747 = vrsqrt.f32 %v1015_v37  ;;  %v236_v11 = vsub.f32 %v879_v0, %v1007_v30  ;;  %vm1067_vm5 = vmor %vm156_vm3, %vm157_vm4  ;;  %vm186_vm6 = vweird.f32 %v1015_v37 }
  0xa3   :  { %v152_v49 = vmul.f32 %v1013_v35, %v151_v41  ;;  %319 = vadd.xlane.f32.xlu0 %v318_v44  ;;  %v1041_v50 = vpop.f32.mrf.mxu0  ;;  %749 = vrsqrt.f32 %v1024_v42  ;;  %v115_v51 = vpop.xlane.xlu2 %114  ;;  %v627_v25 = vsel %vm317_vm2, %v1030_v45, 0.0  ;;  %vm176_vm7 = vweird.f32 %v1024_v42 }
  0xa4   :  { %623 = vadd.xlane.f32.xlu1 %v1019_v39  ;;  %315 = vadd.xlane.f32.xlu2 %v1041_v50  ;;  %751 = vrsqrt.f32 %v1032_v46  ;;  %v124_v55 = vmul.f32 %v115_v51, %v975_v54  ;;  %v113_v56 = vpop.xlane.xlu1 %112  ;;  %v111_v59 = vpop.xlane.xlu0 %110  ;;  %vm166_vm8 = vweird.f32 %v1032_v46 }
  0xa5   :  { %v153_v58 = vmul.f32 0.5, %v152_v49  ;;  %v123_v60 = vmul.f32 %v113_v56, %v975_v54  ;;  %v122_v57 = vmul.f32 %v111_v59, %v975_v54 }
  0xa6   :  { %v140_v62 = vsub.f32 %v124_v55, %v132_v43  ;;  %v1101_v55 = vpop.f32.mrf.mxu1 }
  0xa7   :  { %v154_v17 = vsub.f32 1.5, %v153_v58  ;;  %v139_v18 = vsub.f32 %v123_v60, %v131_v47  ;;  %v138_v28 = vsub.f32 %v122_v57, %v130_v38  ;;  %v1090_v38 = vld [vmem:[%s1586_s2] ss:$0 sm:$0xff] }
  0xa8   :  { %v1065_v23 = vpop.eup %747  ;;  %v1075_v29 = vadd.f32 1e-05, %v140_v62  ;;  %v1112_v57 = vld [vmem:[%s1587_s3] ss:$0 sm:$0xff]  ;;  %v326_v62 = vmul.f32 %v1021_v40, %v1021_v40 }
  0xa9   :  { %v1077_v31 = vpop.eup %749  ;;  %v155_v32 = vmul.f32 %v1013_v35, %v154_v17  ;;  %v311_v34 = vpop.f32.mrf.mxu2  ;;  %v181_v36 = vmul.f32 %v1065_v23, %v1015_v37  ;;  %v1083_v41 = vadd.f32 1e-05, %v139_v18  ;;  %v1095_v49 = vadd.f32 1e-05, %v138_v28 }
  0xaa   :  { %v1085_v43 = vpop.eup %751  ;;  %v171_v44 = vmul.f32 %v1077_v31, %v1024_v42  ;;  %v621_v47 = vpop.f32.mrf.mxu3  ;;  %753 = vrsqrt.f32 %v1075_v29  ;;  %vm187_vm9 = vweird.f32 %v1065_v23  ;;  %vm177_vm10 = vweird.f32 %v1077_v31 }
  0xab   :  { %v159_v51 = vsel %vm1067_vm5, %v1013_v35, %v155_v32  ;;  %v161_v56 = vmul.f32 %v1085_v43, %v1032_v46  ;;  %v182_v58 = vmul.f32 %v1065_v23, %v181_v36  ;;  %628 = vadd.xlane.f32.xlu0 %v627_v25  ;;  %v1107_v59 = vpop.xlane.xlu2 %400  ;;  %755 = vrsqrt.f32 %v1095_v49  ;;  %vm1135_vm12 = vmor %vm186_vm6, %vm187_vm9 }
  0xac   :  { %v238_v60 = vmul.f32 %v230_v53, %v159_v51  ;;  %v172_v35 = vmul.f32 %v1077_v31, %v171_v44  ;;  %327 = vadd.xlane.f32.xlu1 %v324_v26  ;;  %625 = vadd.xlane.f32.xlu2 %v1101_v55  ;;  %v1119_v17 = vpop.xlane.xlu1 %404  ;;  %757 = vrsqrt.f32 %v1083_v41  ;;  %v117_v24 = vpop.xlane.xlu0 %116  ;;  %vm167_vm11 = vweird.f32 %v1085_v43  ;;  %vm1144_vm13 = vmor %vm176_vm7, %vm177_vm10 }
  0xad   :  { %v162_v18 = vmul.f32 %v1085_v43, %v161_v56  ;;  %v183_v53 = vmul.f32 0.5, %v182_v58  ;;  %v125_v28 = vmul.f32 %v117_v24, %v975_v54  ;;  %v634_v36 = vmul.f32 %v1101_v55, %v1101_v55  ;;  %vm1162_vm14 = vmor %vm166_vm8, %vm167_vm11 }
  0xae   :  { %v249_v25 = vmul.f32 %v1090_v38, %v238_v60  ;;  %v173_v26 = vmul.f32 0.5, %v172_v35  ;;  %v325_v58 = vmul.f32 %v1041_v50, %v1041_v50  ;;  %v331_v24 = vsel %vm317_vm2, %v326_v62, 0.0 }
  0xaf   :  { %v163_v32 = vmul.f32 0.5, %v162_v18  ;;  %v184_v34 = vsub.f32 1.5, %v183_v53  ;;  %v141_v60 = vsub.f32 %v125_v28, %v1061_v3  ;;  %vm196_vm15 = vweird.f32 %v1095_v49 }
  0xb0   :  { %v1130_v44 = vpop.eup %753  ;;  %v260_v47 = vadd.f32 %v1112_v57, %v249_v25  ;;  %v174_v51 = vsub.f32 1.5, %v173_v26  ;;  %v635_v62 = vmul.f32 %v1030_v45, %v1030_v45  ;;  %vm216_vm0 = vweird.f32 %v1075_v29 }
  0xb1   :  { %v164_v18 = vsub.f32 1.5, %v163_v32  ;;  %v185_v53 = vmul.f32 %v1065_v23, %v184_v34  ;;  %v211_v37 = vmul.f32 %v1130_v44, %v1075_v29  ;;  %v1152_v25 = vpop.eup %755  ;;  %v1167_v26 = vadd.f32 1e-05, %v141_v60 }
  0xb2   :  { %268 = vst [vmem:[%s1588_s4] sm:$0xff] %v260_v47  ;;  %v175_v42 = vmul.f32 %v1077_v31, %v174_v51  ;;  %v1171_v28 = vpop.eup %757  ;;  %v191_v46 = vmul.f32 %v1152_v25, %v1095_v49  ;;  %vm217_vm1 = vweird.f32 %v1130_v44  ;;  %vm197_vm3 = vweird.f32 %v1152_v25 }
  0xb3   :  { %v165_v32 = vmul.f32 %v1085_v43, %v164_v18  ;;  %v189_v34 = vsel %vm1135_vm12, %v1065_v23, %v185_v53  ;;  %638 = vadd.xlane.f32.xlu0 %v634_v36  ;;  %v1180_v47 = vpop.xlane.xlu2 %406  ;;  %v212_v18 = vmul.f32 %v1130_v44, %v211_v37  ;;  %v201_v13 = vmul.f32 %v1171_v28, %v1083_v41  ;;  %vm1217_vm5 = vmor %vm216_vm0, %vm217_vm1 }
  0xb4   :  { %v179_v51 = vsel %vm1144_vm13, %v1077_v31, %v175_v42  ;;  %v241_v60 = vmul.f32 %v233_v61, %v189_v34  ;;  %332 = vadd.xlane.f32.xlu2 %v331_v24  ;;  %329 = vadd.xlane.f32.xlu1 %v325_v58  ;;  %v1190_v23 = vpop.xlane.xlu1 %410  ;;  %v192_v56 = vmul.f32 %v1152_v25, %v191_v46  ;;  %v403_v63 = vpop.xlane.xlu0 %402  ;;  %759 = vrsqrt.f32 %v1167_v26  ;;  %vm1230_vm7 = vmor %vm196_vm15, %vm197_vm3 }
  0xb5   :  { %v240_v36 = vmul.f32 %v232_v52, %v179_v51  ;;  %v169_v31 = vsel %vm1162_vm14, %v1085_v43, %v165_v32  ;;  %v213_v35 = vmul.f32 0.5, %v212_v18  ;;  %v202_v52 = vmul.f32 %v1171_v28, %v201_v13 }
  0xb6   :  { %v239_v61 = vmul.f32 %v231_v14, %v169_v31  ;;  %v252_v58 = vmul.f32 %v1090_v38, %v241_v60  ;;  %v193_v7 = vmul.f32 0.5, %v192_v56  ;;  %vm206_vm4 = vweird.f32 %v1083_v41 }
  0xb7   :  { %v251_v12 = vmul.f32 %v1090_v38, %v240_v36  ;;  %v214_v37 = vsub.f32 1.5, %v213_v35  ;;  %v203_v24 = vmul.f32 0.5, %v202_v52  ;;  %vm207_vm6 = vweird.f32 %v1171_v28 }
  0xb8   :  { %v250_v43 = vmul.f32 %v1090_v38, %v239_v61  ;;  %v263_v53 = vadd.f32 %v1112_v57, %v252_v58  ;;  %v194_v10 = vsub.f32 1.5, %v193_v7  ;;  %v234_v42 = vsub.f32 %v889_v5, %v1003_v27  ;;  %vm1256_vm8 = vmor %vm206_vm4, %vm207_vm6 }
  0xb9   :  { %v262_v20 = vadd.f32 %v1112_v57, %v251_v12  ;;  %v215_v32 = vmul.f32 %v1130_v44, %v214_v37  ;;  %v633_v34 = vmul.f32 %v1019_v39, %v1019_v39  ;;  %v204_v27 = vsub.f32 1.5, %v203_v24 }
  0xba   :  { %v261_v3 = vadd.f32 %v1112_v57, %v250_v43  ;;  %271 = vst [vmem:[%s1588_s4 + $0x18] sm:$0xff] %v263_v53  ;;  %v195_v5 = vmul.f32 %v1152_v25, %v194_v10  ;;  %v640_v46 = vsel %vm317_vm2, %v635_v62, 0.0  ;;  %v760_v49 = vpop.eup %759  ;;  %v235_v60 = vsub.f32 %v891_v6, %v1011_v33 }
  0xbb   :  { %270 = vst [vmem:[%s1588_s4 + $0x10] sm:$0xff] %v262_v20  ;;  %v1242_v51 = vpop.xlane.xlu2 %412  ;;  %v219_v18 = vsel %vm1217_vm5, %v1130_v44, %v215_v32  ;;  %v1261_v6 = vmul.f32 %v403_v63, %v975_v54  ;;  %v205_v41 = vmul.f32 %v1171_v28, %v204_v27  ;;  %v221_v31 = vmul.f32 %v760_v49, %v1167_v26 }
  0xbc   :  { %269 = vst [vmem:[%s1588_s4 + $0x8] sm:$0xff] %v261_v3  ;;  %636 = vadd.xlane.f32.xlu2 %v633_v34  ;;  %641 = vadd.xlane.f32.xlu1 %v640_v46  ;;  %v435_v33 = vpop.xlane.xlu1 %434  ;;  %v199_v36 = vsel %vm1230_vm7, %v1152_v25, %v195_v5  ;;  %v244_v44 = vmul.f32 %v236_v11, %v219_v18  ;;  %v409_v56 = vpop.xlane.xlu0 %408  ;;  %vm226_vm2 = vweird.f32 %v1167_v26  ;;  %vm227_vm9 = vweird.f32 %v760_v49 }
  0xbd   :  { %v242_v13 = vmul.f32 %v234_v42, %v199_v36  ;;  %v1273_v61 = vmul.f32 %v1119_v17, %v975_v54  ;;  %v209_v25 = vsel %vm1256_vm8, %v1171_v28, %v205_v41  ;;  %v222_v58 = vmul.f32 %v760_v49, %v221_v31  ;;  %vm228_vm10 = vmor %vm226_vm2, %vm227_vm9 }
  0xbe   :  { %v255_v63 = vmul.f32 %v1090_v38, %v244_v44  ;;  %v1280_v0 = vmul.f32 %v409_v56, %v975_v54  ;;  %v243_v11 = vmul.f32 %v235_v60, %v209_v25  ;;  %v457_v17 = vmul.f32 %v1261_v6, %v1261_v6 }
  0xbf   :  { %v253_v30 = vmul.f32 %v1090_v38, %v242_v13  ;;  %v223_v12 = vmul.f32 0.5, %v222_v58  ;;  %v458_v52 = vmul.f32 %v1273_v61, %v1273_v61  ;;  %v449_v20 = vmul.f32 %v435_v33, %v975_v54 }
  0xc0   :  { %v266_v35 = vadd.f32 %v1112_v57, %v255_v63  ;;  %v254_v28 = vmul.f32 %v1090_v38, %v243_v11  ;;  %v460_v53 = vmul.f32 %v1280_v0, %v1280_v0  ;;  %v237_v10 = vsub.f32 %v881_v1, %v1038_v48 }
  0xc1   :  { %v264_v7 = vadd.f32 %v1112_v57, %v253_v30  ;;  %v224_v43 = vsub.f32 1.5, %v223_v12  ;;  %v465_v32 = vsub.f32 %v449_v20, %v457_v17  ;;  %v1312_v1 = vmul.f32 %v1190_v23, %v975_v54 }
  0xc2   :  { %274 = vst [vmem:[%s1588_s4 + $0x30] sm:$0xff] %v266_v35  ;;  %v265_v14 = vadd.f32 %v1112_v57, %v254_v28  ;;  %v1319_v18 = vmul.f32 %v1107_v59, %v975_v54  ;;  %v1339_v25 = vmul.f32 %v1180_v47, %v975_v54 }
  0xc3   :  { %v437_v37 = vpop.xlane.xlu2 %436  ;;  %272 = vst [vmem:[%s1588_s4 + $0x20] sm:$0xff] %v264_v7  ;;  %v225_v3 = vmul.f32 %v760_v49, %v224_v43  ;;  %v473_v27 = vadd.f32 1e-05, %v465_v32  ;;  %v461_v23 = vmul.f32 %v1312_v1, %v1312_v1  ;;  %v561_v43 = vsub.f32 %v924_v22, %v1261_v6 }
  0xc4   :  { %v450_v24 = vmul.f32 %v437_v37, %v975_v54  ;;  %v441_v42 = vpop.xlane.xlu1 %440  ;;  %v415_v29 = vpop.xlane.xlu0 %414  ;;  %273 = vst [vmem:[%s1588_s4 + $0x28] sm:$0xff] %v265_v14  ;;  %v456_v59 = vmul.f32 %v1319_v18, %v1319_v18  ;;  %v459_v47 = vmul.f32 %v1339_v25, %v1339_v25  ;;  %v1357_v14 = vmul.f32 %v1242_v51, %v975_v54 }
  0xc5   :  { %v452_v34 = vmul.f32 %v441_v42, %v975_v54  ;;  %v229_v5 = vsel %vm228_vm10, %v760_v49, %v225_v3  ;;  %v1315_v26 = vmul.f32 %v415_v29, %v975_v54  ;;  %761 = vrsqrt.f32 %v473_v27 }
  0xc6   :  { %v466_v48 = vsub.f32 %v450_v24, %v458_v52  ;;  %v245_v60 = vmul.f32 %v237_v10, %v229_v5  ;;  %vm496_vm11 = vweird.f32 %v473_v27  ;;  %v562_v51 = vsub.f32 %v910_v15, %v1273_v61 }
  0xc7   :  { %v468_v46 = vsub.f32 %v452_v34, %v460_v53  ;;  %v463_v49 = vmul.f32 %v1315_v26, %v1315_v26  ;;  %v564_v32 = vsub.f32 %v895_v8, %v1280_v0  ;;  %v462_v5 = vmul.f32 %v1357_v14, %v1357_v14 }
  0xc8   :  { %v474_v62 = vadd.f32 1e-05, %v466_v48  ;;  %v256_v36 = vmul.f32 %v1090_v38, %v245_v60 }
  0xc9   :  { %v1321_v33 = vadd.f32 1e-05, %v468_v46  ;;  %v567_v46 = vsub.f32 %v887_v4, %v1315_v26 }
  0xca   :  { %763 = vrsqrt.f32 %v474_v62  ;;  %v267_v41 = vadd.f32 %v1112_v57, %v256_v36  ;;  %vm506_vm13 = vweird.f32 %v474_v62 }
  0xcb   :  { %v443_v44 = vpop.xlane.xlu2 %442  ;;  %765 = vrsqrt.f32 %v1321_v33  ;;  %v762_v11 = vpop.eup %761  ;;  %vm526_vm0 = vweird.f32 %v1321_v33 }
  0xcc   :  { %v453_v31 = vmul.f32 %v443_v44, %v975_v54  ;;  %v447_v56 = vpop.xlane.xlu1 %446  ;;  %v433_v13 = vpop.xlane.xlu0 %432  ;;  %275 = vst [vmem:[%s1588_s4 + $0x38] sm:$0xff] %v267_v41  ;;  %v491_v17 = vmul.f32 %v762_v11, %v473_v27  ;;  %vm497_vm12 = vweird.f32 %v762_v11 }
  0xcd   :  { %v455_v63 = vmul.f32 %v447_v56, %v975_v54  ;;  %v448_v58 = vmul.f32 %v433_v13, %v975_v54  ;;  %vm1371_vm15 = vmor %vm496_vm11, %vm497_vm12 }
  0xce   :  { %v469_v30 = vsub.f32 %v453_v31, %v461_v23  ;;  %v492_v20 = vmul.f32 %v762_v11, %v491_v17 }
  0xcf   :  { %v471_v35 = vsub.f32 %v455_v63, %v463_v49  ;;  %v464_v7 = vsub.f32 %v448_v58, %v456_v59 }
  0xd0   :  { %v764_v12 = vpop.eup %763  ;;  %v1342_v28 = vadd.f32 1e-05, %v469_v30  ;;  %v493_v22 = vmul.f32 0.5, %v492_v20 }
  0xd1   :  { %v1344_v52 = vpop.eup %765  ;;  %v501_v53 = vmul.f32 %v764_v12, %v474_v62  ;;  %v1348_v37 = vadd.f32 1e-05, %v471_v35  ;;  %v1352_v10 = vadd.f32 1e-05, %v464_v7  ;;  %vm507_vm14 = vweird.f32 %v764_v12 }
  0xd2   :  { %767 = vrsqrt.f32 %v1342_v28  ;;  %v521_v42 = vmul.f32 %v1344_v52, %v1321_v33  ;;  %v494_v34 = vsub.f32 1.5, %v493_v22  ;;  %vm1378_vm1 = vmor %vm506_vm13, %vm507_vm14  ;;  %vm536_vm3 = vweird.f32 %v1342_v28 }
  0xd3   :  { %v502_v24 = vmul.f32 %v764_v12, %v501_v53  ;;  %769 = vrsqrt.f32 %v1348_v37  ;;  %vm527_vm4 = vweird.f32 %v1344_v52  ;;  %vm486_vm5 = vweird.f32 %v1352_v10 }
  0xd4   :  { %771 = vrsqrt.f32 %v1352_v10  ;;  %v522_v3 = vmul.f32 %v1344_v52, %v521_v42  ;;  %v439_v29 = vpop.xlane.xlu0 %438  ;;  %v495_v8 = vmul.f32 %v762_v11, %v494_v34  ;;  %vm556_vm6 = vweird.f32 %v1348_v37  ;;  %vm1404_vm8 = vmor %vm526_vm0, %vm527_vm4 }
  0xd5   :  { %v503_v6 = vmul.f32 0.5, %v502_v24  ;;  %v451_v48 = vmul.f32 %v439_v29, %v975_v54  ;;  %v565_v34 = vsub.f32 %v897_v9, %v1312_v1  ;;  %v560_v9 = vsub.f32 %v922_v21, %v1319_v18 }
  0xd6   :  { %v523_v60 = vmul.f32 0.5, %v522_v3  ;;  %v499_v41 = vsel %vm1371_vm15, %v762_v11, %v495_v8 }
  0xd7   :  { %v504_v27 = vsub.f32 1.5, %v503_v6  ;;  %v467_v61 = vsub.f32 %v451_v48, %v459_v47  ;;  %v569_v13 = vmul.f32 %v561_v43, %v499_v41 }
  0xd8   :  { %v1376_v62 = vpop.eup %767  ;;  %v524_v49 = vsub.f32 1.5, %v523_v60 }
  0xd9   :  { %v1384_v0 = vpop.eup %769  ;;  %v505_v36 = vmul.f32 %v764_v12, %v504_v27  ;;  %v531_v23 = vmul.f32 %v1376_v62, %v1342_v28  ;;  %v1391_v59 = vadd.f32 1e-05, %v467_v61  ;;  %vm537_vm7 = vweird.f32 %v1376_v62 }
  0xda   :  { %v772_v44 = vpop.eup %771  ;;  %v551_v31 = vmul.f32 %v1384_v0, %v1348_v37  ;;  %v525_v35 = vmul.f32 %v1344_v52, %v524_v49  ;;  %vm557_vm9 = vweird.f32 %v1384_v0  ;;  %vm1430_vm10 = vmor %vm536_vm3, %vm537_vm7 }
  0xdb   :  { %v509_v56 = vsel %vm1378_vm1, %v764_v12, %v505_v36  ;;  %v481_v63 = vmul.f32 %v772_v44, %v1352_v10  ;;  %v532_v11 = vmul.f32 %v1376_v62, %v531_v23  ;;  %773 = vrsqrt.f32 %v1391_v59  ;;  %vm558_vm12 = vmor %vm556_vm6, %vm557_vm9 }
  0xdc   :  { %v570_v30 = vmul.f32 %v562_v51, %v509_v56  ;;  %v577_v12 = vmul.f32 %v1090_v38, %v569_v13  ;;  %vm487_vm2 = vweird.f32 %v772_v44  ;;  %v552_v7 = vmul.f32 %v1384_v0, %v551_v31  ;;  %v445_v43 = vpop.xlane.xlu0 %444 }
  0xdd   :  { %v482_v17 = vmul.f32 %v772_v44, %v481_v63  ;;  %v533_v53 = vmul.f32 0.5, %v532_v11  ;;  %v529_v47 = vsel %vm1404_vm8, %v1344_v52, %v525_v35  ;;  %v454_v20 = vmul.f32 %v445_v43, %v975_v54  ;;  %vm488_vm11 = vmor %vm486_vm5, %vm487_vm2 }
  0xde   :  { %v578_v33 = vmul.f32 %v1090_v38, %v570_v30  ;;  %v585_v24 = vadd.f32 %v1112_v57, %v577_v12  ;;  %v572_v22 = vmul.f32 %v564_v32, %v529_v47  ;;  %v553_v6 = vmul.f32 0.5, %v552_v7 }
  0xdf   :  { %v483_v42 = vmul.f32 0.5, %v482_v17  ;;  %v534_v29 = vsub.f32 1.5, %v533_v53  ;;  %v470_v51 = vsub.f32 %v454_v20, %v462_v5  ;;  %vm516_vm13 = vweird.f32 %v1391_v59 }
  0xe0   :  { %v586_v3 = vadd.f32 %v1112_v57, %v578_v33  ;;  %713 = vst [vmem:[%s1588_s4 + $0x60] sm:$0xff] %v585_v24  ;;  %v580_v48 = vmul.f32 %v1090_v38, %v572_v22  ;;  %v554_v27 = vsub.f32 1.5, %v553_v6  ;;  %v563_v13 = vsub.f32 %v912_v16, %v1339_v25 }
  0xe1   :  { %v484_v52 = vsub.f32 1.5, %v483_v42  ;;  %v774_v5 = vpop.eup %773  ;;  %v535_v1 = vmul.f32 %v1376_v62, %v534_v29  ;;  %v478_v28 = vadd.f32 1e-05, %v470_v51  ;;  %v566_v17 = vsub.f32 %v883_v2, %v1357_v14 }
  0xe2   :  { %714 = vst [vmem:[%s1588_s4 + $0x68] sm:$0xff] %v586_v3  ;;  %v588_v15 = vadd.f32 %v1112_v57, %v580_v48  ;;  %v511_v8 = vmul.f32 %v774_v5, %v1391_v59  ;;  %v555_v18 = vmul.f32 %v1384_v0, %v554_v27  ;;  %vm517_vm14 = vweird.f32 %v774_v5 }
  0xe3   :  { %v485_v60 = vmul.f32 %v772_v44, %v484_v52  ;;  %v539_v21 = vsel %vm1430_vm10, %v1376_v62, %v535_v1  ;;  %775 = vrsqrt.f32 %v478_v28  ;;  %vm518_vm15 = vmor %vm516_vm13, %vm517_vm14  ;;  %vm546_vm0 = vweird.f32 %v478_v28 }
  0xe4   :  { %v573_v61 = vmul.f32 %v565_v34, %v539_v21  ;;  %716 = vst [vmem:[%s1588_s4 + $0x78] sm:$0xff] %v588_v15  ;;  %v512_v4 = vmul.f32 %v774_v5, %v511_v8  ;;  %v559_v37 = vsel %vm558_vm12, %v1384_v0, %v555_v18 }
  0xe5   :  { %v489_v10 = vsel %vm488_vm11, %v772_v44, %v485_v60  ;;  %v575_v62 = vmul.f32 %v567_v46, %v559_v37 }
  0xe6   :  { %v568_v26 = vmul.f32 %v560_v9, %v489_v10  ;;  %v581_v36 = vmul.f32 %v1090_v38, %v573_v61  ;;  %v513_v23 = vmul.f32 0.5, %v512_v4 }
  0xe7   :  { %v583_v31 = vmul.f32 %v1090_v38, %v575_v62 }
  0xe8   :  { %v576_v49 = vmul.f32 %v1090_v38, %v568_v26  ;;  %v589_v44 = vadd.f32 %v1112_v57, %v581_v36  ;;  %v514_v41 = vsub.f32 1.5, %v513_v23 }
  0xe9   :  { %v776_v56 = vpop.eup %775  ;;  %v591_v63 = vadd.f32 %v1112_v57, %v583_v31 }
  0xea   :  { %v584_v59 = vadd.f32 %v1112_v57, %v576_v49  ;;  %717 = vst [vmem:[%s1588_s4 + $0x80] sm:$0xff] %v589_v44  ;;  %v515_v0 = vmul.f32 %v774_v5, %v514_v41  ;;  %v541_v58 = vmul.f32 %v776_v56, %v478_v28  ;;  %vm547_vm1 = vweird.f32 %v776_v56 }
  0xeb   :  { %719 = vst [vmem:[%s1588_s4 + $0x90] sm:$0xff] %v591_v63  ;;  %vm548_vm3 = vmor %vm546_vm0, %vm547_vm1 }
  0xec   :  { %712 = vst [vmem:[%s1588_s4 + $0x58] sm:$0xff] %v584_v59  ;;  %v519_v30 = vsel %vm518_vm15, %v774_v5, %v515_v0  ;;  %v542_v16 = vmul.f32 %v776_v56, %v541_v58 }
  0xed   :  { %v571_v25 = vmul.f32 %v563_v13, %v519_v30 }
  0xee   :  { %v543_v11 = vmul.f32 0.5, %v542_v16 }
  0xef   :  { %v579_v35 = vmul.f32 %v1090_v38, %v571_v25 }
  0xf0   :  { %v544_v12 = vsub.f32 1.5, %v543_v11 }
  0xf1   :  { %v587_v7 = vadd.f32 %v1112_v57, %v579_v35 }
  0xf2   :  { %v545_v43 = vmul.f32 %v776_v56, %v544_v12 }
  0xf3   :  { %715 = vst [vmem:[%s1588_s4 + $0x70] sm:$0xff] %v587_v7 }
  0xf4   :  { %v549_v33 = vsel %vm548_vm3, %v776_v56, %v545_v43 }
  0xf5   :  { %v574_v53 = vmul.f32 %v566_v17, %v549_v33 }
  0xf7   :  { %v582_v47 = vmul.f32 %v1090_v38, %v574_v53 }
  0xf9   :  { %v590_v20 = vadd.f32 %v1112_v57, %v582_v47 }
  0xfb   :  { %718 = vst [vmem:[%s1588_s4 + $0x88] sm:$0xff] %v590_v20 }
 0x10f   :  { %v314_v24 = vpop.xlane.xlu1 %313 }
 0x110   :  { %v1491_v22 = vmul.f32 %v314_v24, %v975_v54 }
 0x112   :  { %v337_v51 = vmul.f32 %v1491_v22, %v1491_v22  ;;  %v376_v47 = vsub.f32 %v996_v19, %v1491_v22 }
 0x116   :  { %v320_v2 = vpop.xlane.xlu0 %319 }
 0x117   :  { %v624_v14 = vpop.xlane.xlu1 %623  ;;  %v316_v42 = vpop.xlane.xlu2 %315  ;;  %v1503_v5 = vmul.f32 %v320_v2, %v975_v54 }
 0x118   :  { %v1500_v48 = vmul.f32 %v316_v42, %v975_v54  ;;  %v1515_v36 = vmul.f32 %v624_v14, %v975_v54 }
 0x119   :  { %v339_v15 = vmul.f32 %v1503_v5, %v1503_v5  ;;  %v378_v19 = vsub.f32 %v1021_v40, %v1503_v5 }
 0x11a   :  { %v338_v8 = vmul.f32 %v1500_v48, %v1500_v48  ;;  %v646_v13 = vmul.f32 %v1515_v36, %v1515_v36 }
 0x11e   :  { %v629_v6 = vpop.xlane.xlu0 %628 }
 0x11f   :  { %v328_v3 = vpop.xlane.xlu1 %327  ;;  %v626_v29 = vpop.xlane.xlu2 %625  ;;  %v1520_v44 = vmul.f32 %v629_v6, %v975_v54 }
 0x120   :  { %v334_v34 = vmul.f32 %v328_v3, %v975_v54  ;;  %v1497_v32 = vmul.f32 %v626_v29, %v975_v54 }
 0x121   :  { %v648_v59 = vmul.f32 %v1520_v44, %v1520_v44 }
 0x122   :  { %v340_v52 = vsub.f32 %v334_v34, %v337_v51  ;;  %v647_v1 = vmul.f32 %v1497_v32, %v1497_v32 }
 0x124   :  { %v343_v27 = vadd.f32 1e-05, %v340_v52 }
 0x126   :  { %777 = vrsqrt.f32 %v343_v27  ;;  %v639_v9 = vpop.xlane.xlu0 %638  ;;  %vm352_vm5 = vweird.f32 %v343_v27 }
 0x127   :  { %v644_v28 = vmul.f32 %v639_v9, %v975_v54  ;;  %v333_v46 = vpop.xlane.xlu2 %332  ;;  %v330_v60 = vpop.xlane.xlu1 %329 }
 0x128   :  { %v336_v21 = vmul.f32 %v333_v46, %v975_v54  ;;  %v335_v18 = vmul.f32 %v330_v60, %v975_v54  ;;  %v686_v46 = vsub.f32 %v1101_v55, %v1497_v32 }
 0x129   :  { %v650_v10 = vsub.f32 %v644_v28, %v647_v1 }
 0x12a   :  { %v342_v61 = vsub.f32 %v336_v21, %v339_v15  ;;  %v341_v4 = vsub.f32 %v335_v18, %v338_v8  ;;  %v377_v21 = vsub.f32 %v1041_v50, %v1500_v48 }
 0x12b   :  { %v653_v26 = vadd.f32 1e-05, %v650_v10 }
 0x12c   :  { %v778_v37 = vpop.eup %777  ;;  %v345_v23 = vadd.f32 1e-05, %v342_v61  ;;  %v1517_v62 = vadd.f32 1e-05, %v341_v4 }
 0x12d   :  { %v347_v49 = vmul.f32 %v778_v37, %v343_v27  ;;  %779 = vrsqrt.f32 %v653_v26  ;;  %vm353_vm4 = vweird.f32 %v778_v37  ;;  %vm671_vm8 = vweird.f32 %v653_v26 }
 0x12e   :  { %781 = vrsqrt.f32 %v345_v23  ;;  %vm354_vm6 = vmor %vm352_vm5, %vm353_vm4  ;;  %vm372_vm11 = vweird.f32 %v345_v23  ;;  %vm362_vm13 = vweird.f32 %v1517_v62 }
 0x12f   :  { %v348_v41 = vmul.f32 %v778_v37, %v347_v49  ;;  %783 = vrsqrt.f32 %v1517_v62  ;;  %v637_v31 = vpop.xlane.xlu2 %636  ;;  %v642_v56 = vpop.xlane.xlu1 %641 }
 0x130   :  { %v643_v0 = vmul.f32 %v637_v31, %v975_v54  ;;  %v645_v63 = vmul.f32 %v642_v56, %v975_v54 }
 0x131   :  { %v349_v58 = vmul.f32 0.5, %v348_v41 }
 0x132   :  { %v649_v30 = vsub.f32 %v643_v0, %v646_v13  ;;  %v651_v16 = vsub.f32 %v645_v63, %v648_v59  ;;  %v685_v0 = vsub.f32 %v1019_v39, %v1515_v36 }
 0x133   :  { %v780_v25 = vpop.eup %779  ;;  %v350_v11 = vsub.f32 1.5, %v349_v58  ;;  %v687_v58 = vsub.f32 %v1030_v45, %v1520_v44 }
 0x134   :  { %v782_v35 = vpop.eup %781  ;;  %v666_v12 = vmul.f32 %v780_v25, %v653_v26  ;;  %v1529_v17 = vadd.f32 1e-05, %v649_v30  ;;  %v1531_v7 = vadd.f32 1e-05, %v651_v16  ;;  %vm672_vm7 = vweird.f32 %v780_v25 }
 0x135   :  { %v784_v43 = vpop.eup %783  ;;  %v351_v33 = vmul.f32 %v778_v37, %v350_v11  ;;  %v367_v53 = vmul.f32 %v782_v35, %v345_v23  ;;  %vm373_vm2 = vweird.f32 %v782_v35  ;;  %vm673_vm10 = vmor %vm671_vm8, %vm672_vm7 }
 0x136   :  { %v667_v54 = vmul.f32 %v780_v25, %v666_v12  ;;  %v357_v20 = vmul.f32 %v784_v43, %v1517_v62  ;;  %785 = vrsqrt.f32 %v1529_v17  ;;  %vm363_vm9 = vweird.f32 %v784_v43  ;;  %vm374_vm12 = vmor %vm372_vm11, %vm373_vm2 }
 0x137   :  { %v355_v24 = vsel %vm354_vm6, %v778_v37, %v351_v33  ;;  %v368_v2 = vmul.f32 %v782_v35, %v367_v53  ;;  %787 = vrsqrt.f32 %v1531_v7  ;;  %vm364_vm14 = vmor %vm362_vm13, %vm363_vm9  ;;  %vm661_vm1 = vweird.f32 %v1529_v17 }
 0x138   :  { %v379_v14 = vmul.f32 %v376_v47, %v355_v24  ;;  %v668_v42 = vmul.f32 0.5, %v667_v54  ;;  %v358_v6 = vmul.f32 %v784_v43, %v357_v20  ;;  %vm681_vm4 = vweird.f32 %v1531_v7 }
 0x139   :  { %v369_v3 = vmul.f32 0.5, %v368_v2 }
 0x13a   :  { %v382_v29 = vmul.f32 %v1090_v38, %v379_v14  ;;  %v669_v51 = vsub.f32 1.5, %v668_v42  ;;  %v359_v34 = vmul.f32 0.5, %v358_v6 }
 0x13b   :  { %v370_v22 = vsub.f32 1.5, %v369_v3 }
 0x13c   :  { %v786_v52 = vpop.eup %785  ;;  %v385_v27 = vadd.f32 %v1112_v57, %v382_v29  ;;  %v670_v9 = vmul.f32 %v780_v25, %v669_v51  ;;  %v360_v1 = vsub.f32 1.5, %v359_v34 }
 0x13d   :  { %v788_v28 = vpop.eup %787  ;;  %v371_v60 = vmul.f32 %v782_v35, %v370_v22  ;;  %v656_v15 = vmul.f32 %v786_v52, %v1529_v17  ;;  %vm662_vm15 = vweird.f32 %v786_v52 }
 0x13e   :  { %388 = vst [vmem:[%s1588_s4 + $0x40] sm:$0xff] %v385_v27  ;;  %v674_v40 = vsel %vm673_vm10, %v780_v25, %v670_v9  ;;  %v361_v5 = vmul.f32 %v784_v43, %v360_v1  ;;  %v676_v8 = vmul.f32 %v788_v28, %v1531_v7  ;;  %vm682_vm0 = vweird.f32 %v788_v28  ;;  %vm663_vm3 = vmor %vm661_vm1, %vm662_vm15 }
 0x13f   :  { %v689_v55 = vmul.f32 %v686_v46, %v674_v40  ;;  %v375_v32 = vsel %vm374_vm12, %v782_v35, %v371_v60  ;;  %v657_v18 = vmul.f32 %v786_v52, %v656_v15  ;;  %vm683_vm5 = vmor %vm681_vm4, %vm682_vm0 }
 0x140   :  { %v381_v10 = vmul.f32 %v378_v19, %v375_v32  ;;  %v365_v61 = vsel %vm364_vm14, %v784_v43, %v361_v5  ;;  %v677_v4 = vmul.f32 %v788_v28, %v676_v8 }
 0x141   :  { %v692_v26 = vmul.f32 %v1090_v38, %v689_v55  ;;  %v380_v37 = vmul.f32 %v377_v21, %v365_v61  ;;  %v658_v23 = vmul.f32 0.5, %v657_v18 }
 0x142   :  { %v384_v49 = vmul.f32 %v1090_v38, %v381_v10  ;;  %v678_v62 = vmul.f32 0.5, %v677_v4 }
 0x143   :  { %v695_v41 = vadd.f32 %v1112_v57, %v692_v26  ;;  %v383_v31 = vmul.f32 %v1090_v38, %v380_v37  ;;  %v659_v50 = vsub.f32 1.5, %v658_v23 }
 0x144   :  { %v387_v48 = vadd.f32 %v1112_v57, %v384_v49  ;;  %v679_v56 = vsub.f32 1.5, %v678_v62 }
 0x145   :  { %723 = vst [vmem:[%s1588_s4 + $0xa0] sm:$0xff] %v695_v41  ;;  %v386_v13 = vadd.f32 %v1112_v57, %v383_v31  ;;  %v660_v59 = vmul.f32 %v786_v52, %v659_v50 }
 0x146   :  { %390 = vst [vmem:[%s1588_s4 + $0x50] sm:$0x1f] %v387_v48  ;;  %v680_v63 = vmul.f32 %v788_v28, %v679_v56 }
 0x147   :  { %389 = vst [vmem:[%s1588_s4 + $0x48] sm:$0xff] %v386_v13  ;;  %v664_v30 = vsel %vm663_vm3, %v786_v52, %v660_v59 }
 0x148   :  { %v688_v16 = vmul.f32 %v685_v0, %v664_v30  ;;  %v684_v25 = vsel %vm683_vm5, %v788_v28, %v680_v63 }
 0x149   :  { %v690_v39 = vmul.f32 %v687_v58, %v684_v25 }
 0x14a   :  { %v691_v36 = vmul.f32 %v1090_v38, %v688_v16 }
 0x14b   :  { %v693_v11 = vmul.f32 %v1090_v38, %v690_v39 }
 0x14c   :  { %v694_v35 = vadd.f32 %v1112_v57, %v691_v36 }
 0x14d   :  { %v696_v12 = vadd.f32 %v1112_v57, %v693_v11 }
 0x14e   :  { %722 = vst [vmem:[%s1588_s4 + $0x98] sm:$0xff] %v694_v35 }
 0x14f   :  { %724 = vst [vmem:[%s1588_s4 + $0xa8] sm:$0x1f] %v696_v12 }
 0x150   :  { %704 = vsyncpa [#allocation3], 1 }
 0x151   :  { %705 = vsyncpa [#allocation5], 1 }

// kernel: tpu_custom_call.1
= control target key start
LH: loop header
LB: loop body
LE: loop exit
PB: predicated region body
PF: predicated region fallthrough
CT: control target
= control target key end

     0   :  { %9 = vsyncpa [#allocation3], 0  ;;  %s1584_s0 = inlined_call_operand.hbm [shape: bf16[21,64], index: 0, kind: input, shape index: {}]   ;;  %s1585_s1 = inlined_call_operand.hbm [shape: f32[2,64,128], index: 1, kind: input, shape index: {}]   ;;  %s1586_s2 = inlined_call_operand.vmem [shape: f32[1,128], index: 2, kind: input, shape index: {}]   ;;  %s1587_s3 = inlined_call_operand.vmem [shape: f32[1,128], index: 3, kind: input, shape index: {}]   ;;  %s1588_s4 = inlined_call_operand.vmem [shape: f32[2,85,128], index: 4, kind: output, shape index: {}]  }
   0x1   :  { %s15_s17 = sshll.u32 %s1584_s0, 4  ;;  %s16_s17 = int_to_ptr.hbm [resolvable:$true] %s15_s17 }
   0x2   :  { %10 = vsyncpa [#allocation5], 0  ;;  %s841_s18 = smov [#allocation2]   ;;  %s28_s22 = sshll.u32 %s1585_s1, 4  ;;  %s29_s22 = int_to_ptr.hbm [resolvable:$true] %s28_s22 }
   0x3   :  { %s17_s19 = sshll.u32 %s841_s18, 4  ;;  %s842_s23 = smov 64   ;;  %s18_s19 = int_to_ptr.vmem [resolvable:$true] %s17_s19 }
   0x4   :  { %s843_s24 = smov 4   ;;  %s844_s25 = smov [#allocation4]  }
   0x5   :  { %23 = dma.hbm_to_vmem [thread:$0]  %s16_s17, 192, %s18_s19, [#allocation3], %s842_s23, %s842_s23, %s843_s24  }
   0x6   :  { %s30_s26 = sshll.u32 %s844_s25, 4  ;;  %s845_s27 = smov 128   ;;  %s31_s26 = int_to_ptr.vmem [resolvable:$true] %s30_s26 }
   0x7   :  { %s846_s28 = smov 8  }
   0x8   :  { %36 = dma.hbm_to_vmem [thread:$0]  %s29_s22, 2048, %s31_s26, [#allocation5], %s845_s27, %s845_s27, %s846_s28  }
   0x9   :  { %837 = dma.done.wait [#allocation3], 192  }
   0xa   :  { %838 = vsyncadd [#allocation3], 4294967104 }
   0xb   :  { %839 = dma.done.wait [#allocation5], 2048  }
   0xc   :  { %840 = vsyncadd [#allocation5], 4294965248  ;;  %v879_v0 = vld [vmem:[#allocation4 + $0x30] sm:$0xff]  ;;  %v881_v1 = vld [vmem:[#allocation4 + $0x38] sm:$0xff]  ;;  %vm288_vm0 = vcmask 523264   ;;  %v847_v44 = vmov 128.0  }
   0xd   :  { %v883_v2 = vld [vmem:[#allocation4 + $0x70] sm:$0xff]  ;;  %v279_v3 = vpack.c.bf16 %v881_v1, %v879_v0  ;;  %v887_v4 = vld [vmem:[#allocation4 + $0x78] sm:$0xff]  ;;  %v889_v5 = vld [vmem:[#allocation4 + $0x20] sm:$0xff]  ;;  %v100_v32 = vmul.f32 %v879_v0, %v879_v0  ;;  %v101_v35 = vmul.f32 %v881_v1, %v881_v1  ;;  %743 = vrcp.f32 %v847_v44 }
   0xe   :  { %v891_v6 = vld [vmem:[#allocation4 + $0x28] sm:$0xff]  ;;  %v604_v7 = vpack.c.bf16 %v887_v4, %v883_v2  ;;  %v895_v8 = vld [vmem:[#allocation4 + $0x60] sm:$0xff]  ;;  %71 = vadd.xlane.f32.xlu2 %v889_v5  ;;  %v904_v12 = vld [vmem:[#allocation4 + $0x10] sm:$0xff]  ;;  %v98_v33 = vmul.f32 %v889_v5, %v889_v5  ;;  %v431_v41 = vmul.f32 %v887_v4, %v887_v4  ;;  %v430_v43 = vmul.f32 %v883_v2, %v883_v2 }
   0xf   :  { %v897_v9 = vld [vmem:[#allocation4 + $0x68] sm:$0xff]  ;;  %299 = vmatpush.bf16.msra.mxu0 %v279_v3  ;;  %726 = vmatpush.bf16.msra.mxu2 %v279_v3  ;;  %v278_v10 = vpack.c.bf16 %v891_v6, %v889_v5  ;;  %v906_v13 = vld [vmem:[#allocation4 + $0x18] sm:$0xff]  ;;  %v908_v14 = vld [vmem:[#allocation4] sm:$0xff]  ;;  %v96_v30 = vmul.f32 %v904_v12, %v904_v12  ;;  %v99_v34 = vmul.f32 %v891_v6, %v891_v6  ;;  %vm317_vm2 = vcmask 1044480  }
  0x10   :  { %609 = vmatpush.bf16.msra.mxu1 %v604_v7  ;;  %v603_v11 = vpack.c.bf16 %v897_v9, %v895_v8  ;;  %730 = vmatpush.bf16.msra.mxu3 %v604_v7  ;;  %v910_v15 = vld [vmem:[#allocation4 + $0x50] sm:$0xff]  ;;  %v912_v16 = vld [vmem:[#allocation4 + $0x58] sm:$0xff]  ;;  %v277_v17 = vpack.c.bf16 %v906_v13, %v904_v12  ;;  %v920_v20 = vld [vmem:[#allocation4 + $0x8] sm:$0xff]  ;;  %v94_v28 = vmul.f32 %v908_v14, %v908_v14 }
  0x11   :  { %67 = vadd.xlane.f32.xlu1 %v904_v12  ;;  %63 = vadd.xlane.f32.xlu0 %v908_v14  ;;  %v54_v18 = vld [vmem:[#allocation2 + $0x8] sm:$0x7]  ;;  %v602_v19 = vpack.c.bf16 %v912_v16, %v910_v15  ;;  %v922_v21 = vld [vmem:[#allocation4 + $0x40] sm:$0xff]  ;;  %v924_v22 = vld [vmem:[#allocation4 + $0x48] sm:$0xff]  ;;  %v276_v24 = vpack.c.bf16 %v920_v20, %v908_v14  ;;  %v97_v29 = vmul.f32 %v906_v13, %v906_v13 }
  0x12   :  { %v285_v23 = vunpack.c.l.b16 %v54_v18  ;;  %v601_v25 = vpack.c.bf16 %v924_v22, %v922_v21  ;;  %v725_v26 = vld [vmem:[#allocation2] sm:$0xff]  ;;  %v95_v31 = vmul.f32 %v920_v20, %v920_v20  ;;  %v425_v36 = vmul.f32 %v924_v22, %v924_v22 }
  0x13   :  { %300 = vmatpush.bf16.msra.mxu0 %v278_v10  ;;  %727 = vmatpush.bf16.msra.mxu2 %v278_v10  ;;  %v426_v37 = vmul.f32 %v910_v15, %v910_v15  ;;  %v428_v38 = vmul.f32 %v895_v8, %v895_v8  ;;  %v429_v39 = vmul.f32 %v897_v9, %v897_v9  ;;  %v744_v45 = vpop.eup %743 }
  0x14   :  { %610 = vmatpush.bf16.msra.mxu1 %v603_v11  ;;  %731 = vmatpush.bf16.msra.mxu3 %v603_v11  ;;  %v287_v27 = vpack.c.b16 %v285_v23, %v285_v23  ;;  %v424_v40 = vmul.f32 %v922_v21, %v922_v21  ;;  %v427_v42 = vmul.f32 %v912_v16, %v912_v16  ;;  %v80_v46 = vmul.f32 128.0, %v744_v45 }
  0x15   :  { %vm84_vm1 = vweird.f32 %v744_v45 }
  0x16   :  { %73 = vadd.xlane.f32.xlu2 %v891_v6  ;;  %v81_v47 = vsub.f32 1.0, %v80_v46 }
  0x17   :  { %301 = vmatpush.bf16.msra.mxu0 %v277_v17  ;;  %728 = vmatpush.bf16.msra.mxu2 %v277_v17 }
  0x18   :  { %611 = vmatpush.bf16.msra.mxu1 %v602_v19  ;;  %732 = vmatpush.bf16.msra.mxu3 %v602_v19  ;;  %v82_v49 = vmul.f32 %v744_v45, %v81_v47 }
  0x19   :  { %69 = vadd.xlane.f32.xlu1 %v906_v13  ;;  %65 = vadd.xlane.f32.xlu0 %v920_v20 }
  0x1a   :  { %v83_v52 = vadd.f32 %v744_v45, %v82_v49 }
  0x1b   :  { %302 = vmatpush.bf16.msra.mxu0 %v276_v24  ;;  %729 = vmatpush.bf16.msra.mxu2 %v276_v24 }
  0x1c   :  { %612 = vmatpush.bf16.msra.mxu1 %v601_v25  ;;  %733 = vmatpush.bf16.msra.mxu3 %v601_v25  ;;  %v975_v54 = vsel %vm84_vm1, %v744_v45, %v83_v52 }
  0x1e   :  { %710 = vmatmul.msk.bf16.vlgmr.msra.gmra.mxu0 %vm288_vm0, %v725_v26  ;;  %711 = vmatmul.msk.bf16.vlgmr.msra.gmra.mxu2 %vm288_vm0, %v287_v27 }
  0x1f   :  { %720 = vmatmul.msk.bf16.vlgmr.msra.gmra.mxu1 %vm288_vm0, %v725_v26  ;;  %721 = vmatmul.msk.bf16.vlgmr.msra.gmra.mxu3 %vm288_vm0, %v287_v27 }
  0x20   :  { %102 = vadd.xlane.f32.xlu2 %v94_v28 }
  0x21   :  { %77 = vadd.xlane.f32.xlu1 %v881_v1  ;;  %75 = vadd.xlane.f32.xlu0 %v879_v0 }
  0x28   :  { %108 = vadd.xlane.f32.xlu2 %v97_v29 }
  0x29   :  { %106 = vadd.xlane.f32.xlu1 %v96_v30  ;;  %104 = vadd.xlane.f32.xlu0 %v95_v31 }
  0x30   :  { %114 = vadd.xlane.f32.xlu2 %v100_v32 }
  0x31   :  { %110 = vadd.xlane.f32.xlu0 %v98_v33  ;;  %112 = vadd.xlane.f32.xlu1 %v99_v34 }
  0x38   :  { %400 = vadd.xlane.f32.xlu2 %v922_v21 }
  0x39   :  { %116 = vadd.xlane.f32.xlu0 %v101_v35  ;;  %404 = vadd.xlane.f32.xlu1 %v910_v15 }
  0x40   :  { %406 = vadd.xlane.f32.xlu2 %v912_v16 }
  0x41   :  { %402 = vadd.xlane.f32.xlu0 %v924_v22  ;;  %410 = vadd.xlane.f32.xlu1 %v897_v9 }
  0x48   :  { %412 = vadd.xlane.f32.xlu2 %v883_v2 }
  0x49   :  { %408 = vadd.xlane.f32.xlu0 %v895_v8  ;;  %434 = vadd.xlane.f32.xlu1 %v425_v36 }
  0x50   :  { %436 = vadd.xlane.f32.xlu2 %v426_v37 }
  0x51   :  { %414 = vadd.xlane.f32.xlu0 %v887_v4  ;;  %440 = vadd.xlane.f32.xlu1 %v428_v38 }
  0x58   :  { %442 = vadd.xlane.f32.xlu2 %v429_v39 }
  0x59   :  { %432 = vadd.xlane.f32.xlu0 %v424_v40  ;;  %446 = vadd.xlane.f32.xlu1 %v431_v41 }
  0x61   :  { %438 = vadd.xlane.f32.xlu0 %v427_v42 }
  0x69   :  { %444 = vadd.xlane.f32.xlu0 %v430_v43 }
  0x81   :  { %v72_v48 = vpop.xlane.xlu2 %71 }
  0x82   :  { %v1003_v27 = vmul.f32 %v975_v54, %v72_v48 }
  0x84   :  { %v68_v50 = vpop.xlane.xlu1 %67  ;;  %v64_v51 = vpop.xlane.xlu0 %63  ;;  %v130_v38 = vmul.f32 %v1003_v27, %v1003_v27 }
  0x85   :  { %v978_v57 = vmul.f32 %v975_v54, %v64_v51  ;;  %v987_v7 = vmul.f32 %v975_v54, %v68_v50 }
  0x87   :  { %v126_v58 = vmul.f32 %v978_v57, %v978_v57  ;;  %v128_v18 = vmul.f32 %v987_v7, %v987_v7  ;;  %v232_v52 = vsub.f32 %v904_v12, %v987_v7 }
  0x89   :  { %v74_v53 = vpop.xlane.xlu2 %73 }
  0x8a   :  { %v1011_v33 = vmul.f32 %v975_v54, %v74_v53  ;;  %v230_v53 = vsub.f32 %v908_v14, %v978_v57 }
  0x8c   :  { %v70_v55 = vpop.xlane.xlu1 %69  ;;  %v66_v56 = vpop.xlane.xlu0 %65  ;;  %v131_v47 = vmul.f32 %v1011_v33, %v1011_v33 }
  0x8d   :  { %v984_v63 = vmul.f32 %v975_v54, %v70_v55  ;;  %v990_v10 = vmul.f32 %v975_v54, %v66_v56 }
  0x8f   :  { %v129_v17 = vmul.f32 %v984_v63, %v984_v63  ;;  %v127_v24 = vmul.f32 %v990_v10, %v990_v10  ;;  %v231_v14 = vsub.f32 %v920_v20, %v990_v10 }
  0x93   :  { %v103_v59 = vpop.xlane.xlu2 %102 }
  0x94   :  { %v78_v60 = vpop.xlane.xlu1 %77  ;;  %v76_v61 = vpop.xlane.xlu0 %75  ;;  %v118_v62 = vmul.f32 %v103_v59, %v975_v54 }
  0x95   :  { %v1007_v30 = vmul.f32 %v975_v54, %v76_v61  ;;  %v1038_v48 = vmul.f32 %v975_v54, %v78_v60  ;;  %v233_v61 = vsub.f32 %v906_v13, %v984_v63 }
  0x96   :  { %v134_v3 = vsub.f32 %v118_v62, %v126_v58 }
  0x97   :  { %v132_v43 = vmul.f32 %v1007_v30, %v1007_v30 }
  0x98   :  { %v142_v11 = vadd.f32 1e-05, %v134_v3  ;;  %v1061_v3 = vmul.f32 %v1038_v48, %v1038_v48 }
  0x9a   :  { %745 = vrsqrt.f32 %v142_v11  ;;  %vm156_vm3 = vweird.f32 %v142_v11 }
  0x9b   :  { %v996_v19 = vpop.f32.mrf.mxu0  ;;  %v109_v23 = vpop.xlane.xlu2 %108 }
  0x9c   :  { %313 = vadd.xlane.f32.xlu1 %v996_v19  ;;  %v107_v25 = vpop.xlane.xlu1 %106  ;;  %v121_v26 = vmul.f32 %v109_v23, %v975_v54  ;;  %v105_v29 = vpop.xlane.xlu0 %104 }
  0x9d   :  { %v120_v28 = vmul.f32 %v107_v25, %v975_v54  ;;  %v119_v31 = vmul.f32 %v105_v29, %v975_v54  ;;  %v1019_v39 = vpop.f32.mrf.mxu1 }
  0x9e   :  { %v137_v32 = vsub.f32 %v121_v26, %v129_v17  ;;  %v324_v26 = vmul.f32 %v996_v19, %v996_v19 }
  0x9f   :  { %v136_v34 = vsub.f32 %v120_v28, %v128_v18  ;;  %v135_v36 = vsub.f32 %v119_v31, %v127_v24 }
  0xa0   :  { %v1013_v35 = vpop.eup %745  ;;  %v1015_v37 = vadd.f32 1e-05, %v137_v32 }
  0xa1   :  { %v1021_v40 = vpop.f32.mrf.mxu2  ;;  %v151_v41 = vmul.f32 %v1013_v35, %v142_v11  ;;  %v1024_v42 = vadd.f32 1e-05, %v136_v34  ;;  %v1032_v46 = vadd.f32 1e-05, %v135_v36  ;;  %vm157_vm4 = vweird.f32 %v1013_v35 }
  0xa2   :  { %v318_v44 = vsel %vm317_vm2, %v1021_v40, 0.0  ;;  %v1030_v45 = vpop.f32.mrf.mxu3  ;;  %747 = vrsqrt.f32 %v1015_v37  ;;  %v236_v11 = vsub.f32 %v879_v0, %v1007_v30  ;;  %vm1067_vm5 = vmor %vm156_vm3, %vm157_vm4  ;;  %vm186_vm6 = vweird.f32 %v1015_v37 }
  0xa3   :  { %v152_v49 = vmul.f32 %v1013_v35, %v151_v41  ;;  %319 = vadd.xlane.f32.xlu0 %v318_v44  ;;  %v1041_v50 = vpop.f32.mrf.mxu0  ;;  %749 = vrsqrt.f32 %v1024_v42  ;;  %v115_v51 = vpop.xlane.xlu2 %114  ;;  %v627_v25 = vsel %vm317_vm2, %v1030_v45, 0.0  ;;  %vm176_vm7 = vweird.f32 %v1024_v42 }
  0xa4   :  { %623 = vadd.xlane.f32.xlu1 %v1019_v39  ;;  %315 = vadd.xlane.f32.xlu2 %v1041_v50  ;;  %751 = vrsqrt.f32 %v1032_v46  ;;  %v124_v55 = vmul.f32 %v115_v51, %v975_v54  ;;  %v113_v56 = vpop.xlane.xlu1 %112  ;;  %v111_v59 = vpop.xlane.xlu0 %110  ;;  %vm166_vm8 = vweird.f32 %v1032_v46 }
  0xa5   :  { %v153_v58 = vmul.f32 0.5, %v152_v49  ;;  %v123_v60 = vmul.f32 %v113_v56, %v975_v54  ;;  %v122_v57 = vmul.f32 %v111_v59, %v975_v54 }
  0xa6   :  { %v140_v62 = vsub.f32 %v124_v55, %v132_v43  ;;  %v1101_v55 = vpop.f32.mrf.mxu1 }
  0xa7   :  { %v154_v17 = vsub.f32 1.5, %v153_v58  ;;  %v139_v18 = vsub.f32 %v123_v60, %v131_v47  ;;  %v138_v28 = vsub.f32 %v122_v57, %v130_v38  ;;  %v1090_v38 = vld [vmem:[%s1586_s2] ss:$0 sm:$0xff] }
  0xa8   :  { %v1065_v23 = vpop.eup %747  ;;  %v1075_v29 = vadd.f32 1e-05, %v140_v62  ;;  %v1112_v57 = vld [vmem:[%s1587_s3] ss:$0 sm:$0xff]  ;;  %v326_v62 = vmul.f32 %v1021_v40, %v1021_v40 }
  0xa9   :  { %v1077_v31 = vpop.eup %749  ;;  %v155_v32 = vmul.f32 %v1013_v35, %v154_v17  ;;  %v311_v34 = vpop.f32.mrf.mxu2  ;;  %v181_v36 = vmul.f32 %v1065_v23, %v1015_v37  ;;  %v1083_v41 = vadd.f32 1e-05, %v139_v18  ;;  %v1095_v49 = vadd.f32 1e-05, %v138_v28 }
  0xaa   :  { %v1085_v43 = vpop.eup %751  ;;  %v171_v44 = vmul.f32 %v1077_v31, %v1024_v42  ;;  %v621_v47 = vpop.f32.mrf.mxu3  ;;  %753 = vrsqrt.f32 %v1075_v29  ;;  %vm187_vm9 = vweird.f32 %v1065_v23  ;;  %vm177_vm10 = vweird.f32 %v1077_v31 }
  0xab   :  { %v159_v51 = vsel %vm1067_vm5, %v1013_v35, %v155_v32  ;;  %v161_v56 = vmul.f32 %v1085_v43, %v1032_v46  ;;  %v182_v58 = vmul.f32 %v1065_v23, %v181_v36  ;;  %628 = vadd.xlane.f32.xlu0 %v627_v25  ;;  %v1107_v59 = vpop.xlane.xlu2 %400  ;;  %755 = vrsqrt.f32 %v1095_v49  ;;  %vm1135_vm12 = vmor %vm186_vm6, %vm187_vm9 }
  0xac   :  { %v238_v60 = vmul.f32 %v230_v53, %v159_v51  ;;  %v172_v35 = vmul.f32 %v1077_v31, %v171_v44  ;;  %327 = vadd.xlane.f32.xlu1 %v324_v26  ;;  %625 = vadd.xlane.f32.xlu2 %v1101_v55  ;;  %v1119_v17 = vpop.xlane.xlu1 %404  ;;  %757 = vrsqrt.f32 %v1083_v41  ;;  %v117_v24 = vpop.xlane.xlu0 %116  ;;  %vm167_vm11 = vweird.f32 %v1085_v43  ;;  %vm1144_vm13 = vmor %vm176_vm7, %vm177_vm10 }
  0xad   :  { %v162_v18 = vmul.f32 %v1085_v43, %v161_v56  ;;  %v183_v53 = vmul.f32 0.5, %v182_v58  ;;  %v125_v28 = vmul.f32 %v117_v24, %v975_v54  ;;  %v634_v36 = vmul.f32 %v1101_v55, %v1101_v55  ;;  %vm1162_vm14 = vmor %vm166_vm8, %vm167_vm11 }
  0xae   :  { %v249_v25 = vmul.f32 %v1090_v38, %v238_v60  ;;  %v173_v26 = vmul.f32 0.5, %v172_v35  ;;  %v325_v58 = vmul.f32 %v1041_v50, %v1041_v50  ;;  %v331_v24 = vsel %vm317_vm2, %v326_v62, 0.0 }
  0xaf   :  { %v163_v32 = vmul.f32 0.5, %v162_v18  ;;  %v184_v34 = vsub.f32 1.5, %v183_v53  ;;  %v141_v60 = vsub.f32 %v125_v28, %v1061_v3  ;;  %vm196_vm15 = vweird.f32 %v1095_v49 }
  0xb0   :  { %v1130_v44 = vpop.eup %753  ;;  %v260_v47 = vadd.f32 %v1112_v57, %v249_v25  ;;  %v174_v51 = vsub.f32 1.5, %v173_v26  ;;  %v635_v62 = vmul.f32 %v1030_v45, %v1030_v45  ;;  %vm216_vm0 = vweird.f32 %v1075_v29 }
  0xb1   :  { %v164_v18 = vsub.f32 1.5, %v163_v32  ;;  %v185_v53 = vmul.f32 %v1065_v23, %v184_v34  ;;  %v211_v37 = vmul.f32 %v1130_v44, %v1075_v29  ;;  %v1152_v25 = vpop.eup %755  ;;  %v1167_v26 = vadd.f32 1e-05, %v141_v60 }
  0xb2   :  { %268 = vst [vmem:[%s1588_s4] sm:$0xff] %v260_v47  ;;  %v175_v42 = vmul.f32 %v1077_v31, %v174_v51  ;;  %v1171_v28 = vpop.eup %757  ;;  %v191_v46 = vmul.f32 %v1152_v25, %v1095_v49  ;;  %vm217_vm1 = vweird.f32 %v1130_v44  ;;  %vm197_vm3 = vweird.f32 %v1152_v25 }
  0xb3   :  { %v165_v32 = vmul.f32 %v1085_v43, %v164_v18  ;;  %v189_v34 = vsel %vm1135_vm12, %v1065_v23, %v185_v53  ;;  %638 = vadd.xlane.f32.xlu0 %v634_v36  ;;  %v1180_v47 = vpop.xlane.xlu2 %406  ;;  %v212_v18 = vmul.f32 %v1130_v44, %v211_v37  ;;  %v201_v13 = vmul.f32 %v1171_v28, %v1083_v41  ;;  %vm1217_vm5 = vmor %vm216_vm0, %vm217_vm1 }
  0xb4   :  { %v179_v51 = vsel %vm1144_vm13, %v1077_v31, %v175_v42  ;;  %v241_v60 = vmul.f32 %v233_v61, %v189_v34  ;;  %332 = vadd.xlane.f32.xlu2 %v331_v24  ;;  %329 = vadd.xlane.f32.xlu1 %v325_v58  ;;  %v1190_v23 = vpop.xlane.xlu1 %410  ;;  %v192_v56 = vmul.f32 %v1152_v25, %v191_v46  ;;  %v403_v63 = vpop.xlane.xlu0 %402  ;;  %759 = vrsqrt.f32 %v1167_v26  ;;  %vm1230_vm7 = vmor %vm196_vm15, %vm197_vm3 }
  0xb5   :  { %v240_v36 = vmul.f32 %v232_v52, %v179_v51  ;;  %v169_v31 = vsel %vm1162_vm14, %v1085_v43, %v165_v32  ;;  %v213_v35 = vmul.f32 0.5, %v212_v18  ;;  %v202_v52 = vmul.f32 %v1171_v28, %v201_v13 }
  0xb6   :  { %v239_v61 = vmul.f32 %v231_v14, %v169_v31  ;;  %v252_v58 = vmul.f32 %v1090_v38, %v241_v60  ;;  %v193_v7 = vmul.f32 0.5, %v192_v56  ;;  %vm206_vm4 = vweird.f32 %v1083_v41 }
  0xb7   :  { %v251_v12 = vmul.f32 %v1090_v38, %v240_v36  ;;  %v214_v37 = vsub.f32 1.5, %v213_v35  ;;  %v203_v24 = vmul.f32 0.5, %v202_v52  ;;  %vm207_vm6 = vweird.f32 %v1171_v28 }
  0xb8   :  { %v250_v43 = vmul.f32 %v1090_v38, %v239_v61  ;;  %v263_v53 = vadd.f32 %v1112_v57, %v252_v58  ;;  %v194_v10 = vsub.f32 1.5, %v193_v7  ;;  %v234_v42 = vsub.f32 %v889_v5, %v1003_v27  ;;  %vm1256_vm8 = vmor %vm206_vm4, %vm207_vm6 }
  0xb9   :  { %v262_v20 = vadd.f32 %v1112_v57, %v251_v12  ;;  %v215_v32 = vmul.f32 %v1130_v44, %v214_v37  ;;  %v633_v34 = vmul.f32 %v1019_v39, %v1019_v39  ;;  %v204_v27 = vsub.f32 1.5, %v203_v24 }
  0xba   :  { %v261_v3 = vadd.f32 %v1112_v57, %v250_v43  ;;  %271 = vst [vmem:[%s1588_s4 + $0x18] sm:$0xff] %v263_v53  ;;  %v195_v5 = vmul.f32 %v1152_v25, %v194_v10  ;;  %v640_v46 = vsel %vm317_vm2, %v635_v62, 0.0  ;;  %v760_v49 = vpop.eup %759  ;;  %v235_v60 = vsub.f32 %v891_v6, %v1011_v33 }
  0xbb   :  { %270 = vst [vmem:[%s1588_s4 + $0x10] sm:$0xff] %v262_v20  ;;  %v1242_v51 = vpop.xlane.xlu2 %412  ;;  %v219_v18 = vsel %vm1217_vm5, %v1130_v44, %v215_v32  ;;  %v1261_v6 = vmul.f32 %v403_v63, %v975_v54  ;;  %v205_v41 = vmul.f32 %v1171_v28, %v204_v27  ;;  %v221_v31 = vmul.f32 %v760_v49, %v1167_v26 }
  0xbc   :  { %269 = vst [vmem:[%s1588_s4 + $0x8] sm:$0xff] %v261_v3  ;;  %636 = vadd.xlane.f32.xlu2 %v633_v34  ;;  %641 = vadd.xlane.f32.xlu1 %v640_v46  ;;  %v435_v33 = vpop.xlane.xlu1 %434  ;;  %v199_v36 = vsel %vm1230_vm7, %v1152_v25, %v195_v5  ;;  %v244_v44 = vmul.f32 %v236_v11, %v219_v18  ;;  %v409_v56 = vpop.xlane.xlu0 %408  ;;  %vm226_vm2 = vweird.f32 %v1167_v26  ;;  %vm227_vm9 = vweird.f32 %v760_v49 }
  0xbd   :  { %v242_v13 = vmul.f32 %v234_v42, %v199_v36  ;;  %v1273_v61 = vmul.f32 %v1119_v17, %v975_v54  ;;  %v209_v25 = vsel %vm1256_vm8, %v1171_v28, %v205_v41  ;;  %v222_v58 = vmul.f32 %v760_v49, %v221_v31  ;;  %vm228_vm10 = vmor %vm226_vm2, %vm227_vm9 }
  0xbe   :  { %v255_v63 = vmul.f32 %v1090_v38, %v244_v44  ;;  %v1280_v0 = vmul.f32 %v409_v56, %v975_v54  ;;  %v243_v11 = vmul.f32 %v235_v60, %v209_v25  ;;  %v457_v17 = vmul.f32 %v1261_v6, %v1261_v6 }
  0xbf   :  { %v253_v30 = vmul.f32 %v1090_v38, %v242_v13  ;;  %v223_v12 = vmul.f32 0.5, %v222_v58  ;;  %v458_v52 = vmul.f32 %v1273_v61, %v1273_v61  ;;  %v449_v20 = vmul.f32 %v435_v33, %v975_v54 }
  0xc0   :  { %v266_v35 = vadd.f32 %v1112_v57, %v255_v63  ;;  %v254_v28 = vmul.f32 %v1090_v38, %v243_v11  ;;  %v460_v53 = vmul.f32 %v1280_v0, %v1280_v0  ;;  %v237_v10 = vsub.f32 %v881_v1, %v1038_v48 }
  0xc1   :  { %v264_v7 = vadd.f32 %v1112_v57, %v253_v30  ;;  %v224_v43 = vsub.f32 1.5, %v223_v12  ;;  %v465_v32 = vsub.f32 %v449_v20, %v457_v17  ;;  %v1312_v1 = vmul.f32 %v1190_v23, %v975_v54 }
  0xc2   :  { %274 = vst [vmem:[%s1588_s4 + $0x30] sm:$0xff] %v266_v35  ;;  %v265_v14 = vadd.f32 %v1112_v57, %v254_v28  ;;  %v1319_v18 = vmul.f32 %v1107_v59, %v975_v54  ;;  %v1339_v25 = vmul.f32 %v1180_v47, %v975_v54 }
  0xc3   :  { %v437_v37 = vpop.xlane.xlu2 %436  ;;  %272 = vst [vmem:[%s1588_s4 + $0x20] sm:$0xff] %v264_v7  ;;  %v225_v3 = vmul.f32 %v760_v49, %v224_v43  ;;  %v473_v27 = vadd.f32 1e-05, %v465_v32  ;;  %v461_v23 = vmul.f32 %v1312_v1, %v1312_v1  ;;  %v561_v43 = vsub.f32 %v924_v22, %v1261_v6 }
  0xc4   :  { %v450_v24 = vmul.f32 %v437_v37, %v975_v54  ;;  %v441_v42 = vpop.xlane.xlu1 %440  ;;  %v415_v29 = vpop.xlane.xlu0 %414  ;;  %273 = vst [vmem:[%s1588_s4 + $0x28] sm:$0xff] %v265_v14  ;;  %v456_v59 = vmul.f32 %v1319_v18, %v1319_v18  ;;  %v459_v47 = vmul.f32 %v1339_v25, %v1339_v25  ;;  %v1357_v14 = vmul.f32 %v1242_v51, %v975_v54 }
  0xc5   :  { %v452_v34 = vmul.f32 %v441_v42, %v975_v54  ;;  %v229_v5 = vsel %vm228_vm10, %v760_v49, %v225_v3  ;;  %v1315_v26 = vmul.f32 %v415_v29, %v975_v54  ;;  %761 = vrsqrt.f32 %v473_v27 }
  0xc6   :  { %v466_v48 = vsub.f32 %v450_v24, %v458_v52  ;;  %v245_v60 = vmul.f32 %v237_v10, %v229_v5  ;;  %vm496_vm11 = vweird.f32 %v473_v27  ;;  %v562_v51 = vsub.f32 %v910_v15, %v1273_v61 }
  0xc7   :  { %v468_v46 = vsub.f32 %v452_v34, %v460_v53  ;;  %v463_v49 = vmul.f32 %v1315_v26, %v1315_v26  ;;  %v564_v32 = vsub.f32 %v895_v8, %v1280_v0  ;;  %v462_v5 = vmul.f32 %v1357_v14, %v1357_v14 }
  0xc8   :  { %v474_v62 = vadd.f32 1e-05, %v466_v48  ;;  %v256_v36 = vmul.f32 %v1090_v38, %v245_v60 }
  0xc9   :  { %v1321_v33 = vadd.f32 1e-05, %v468_v46  ;;  %v567_v46 = vsub.f32 %v887_v4, %v1315_v26 }
  0xca   :  { %763 = vrsqrt.f32 %v474_v62  ;;  %v267_v41 = vadd.f32 %v1112_v57, %v256_v36  ;;  %vm506_vm13 = vweird.f32 %v474_v62 }
  0xcb   :  { %v443_v44 = vpop.xlane.xlu2 %442  ;;  %765 = vrsqrt.f32 %v1321_v33  ;;  %v762_v11 = vpop.eup %761  ;;  %vm526_vm0 = vweird.f32 %v1321_v33 }
  0xcc   :  { %v453_v31 = vmul.f32 %v443_v44, %v975_v54  ;;  %v447_v56 = vpop.xlane.xlu1 %446  ;;  %v433_v13 = vpop.xlane.xlu0 %432  ;;  %275 = vst [vmem:[%s1588_s4 + $0x38] sm:$0xff] %v267_v41  ;;  %v491_v17 = vmul.f32 %v762_v11, %v473_v27  ;;  %vm497_vm12 = vweird.f32 %v762_v11 }
  0xcd   :  { %v455_v63 = vmul.f32 %v447_v56, %v975_v54  ;;  %v448_v58 = vmul.f32 %v433_v13, %v975_v54  ;;  %vm1371_vm15 = vmor %vm496_vm11, %vm497_vm12 }
  0xce   :  { %v469_v30 = vsub.f32 %v453_v31, %v461_v23  ;;  %v492_v20 = vmul.f32 %v762_v11, %v491_v17 }
  0xcf   :  { %v471_v35 = vsub.f32 %v455_v63, %v463_v49  ;;  %v464_v7 = vsub.f32 %v448_v58, %v456_v59 }
  0xd0   :  { %v764_v12 = vpop.eup %763  ;;  %v1342_v28 = vadd.f32 1e-05, %v469_v30  ;;  %v493_v22 = vmul.f32 0.5, %v492_v20 }
  0xd1   :  { %v1344_v52 = vpop.eup %765  ;;  %v501_v53 = vmul.f32 %v764_v12, %v474_v62  ;;  %v1348_v37 = vadd.f32 1e-05, %v471_v35  ;;  %v1352_v10 = vadd.f32 1e-05, %v464_v7  ;;  %vm507_vm14 = vweird.f32 %v764_v12 }
  0xd2   :  { %767 = vrsqrt.f32 %v1342_v28  ;;  %v521_v42 = vmul.f32 %v1344_v52, %v1321_v33  ;;  %v494_v34 = vsub.f32 1.5, %v493_v22  ;;  %vm1378_vm1 = vmor %vm506_vm13, %vm507_vm14  ;;  %vm536_vm3 = vweird.f32 %v1342_v28 }
  0xd3   :  { %v502_v24 = vmul.f32 %v764_v12, %v501_v53  ;;  %769 = vrsqrt.f32 %v1348_v37  ;;  %vm527_vm4 = vweird.f32 %v1344_v52  ;;  %vm486_vm5 = vweird.f32 %v1352_v10 }
  0xd4   :  { %771 = vrsqrt.f32 %v1352_v10  ;;  %v522_v3 = vmul.f32 %v1344_v52, %v521_v42  ;;  %v439_v29 = vpop.xlane.xlu0 %438  ;;  %v495_v8 = vmul.f32 %v762_v11, %v494_v34  ;;  %vm556_vm6 = vweird.f32 %v1348_v37  ;;  %vm1404_vm8 = vmor %vm526_vm0, %vm527_vm4 }
  0xd5   :  { %v503_v6 = vmul.f32 0.5, %v502_v24  ;;  %v451_v48 = vmul.f32 %v439_v29, %v975_v54  ;;  %v565_v34 = vsub.f32 %v897_v9, %v1312_v1  ;;  %v560_v9 = vsub.f32 %v922_v21, %v1319_v18 }
  0xd6   :  { %v523_v60 = vmul.f32 0.5, %v522_v3  ;;  %v499_v41 = vsel %vm1371_vm15, %v762_v11, %v495_v8 }
  0xd7   :  { %v504_v27 = vsub.f32 1.5, %v503_v6  ;;  %v467_v61 = vsub.f32 %v451_v48, %v459_v47  ;;  %v569_v13 = vmul.f32 %v561_v43, %v499_v41 }
  0xd8   :  { %v1376_v62 = vpop.eup %767  ;;  %v524_v49 = vsub.f32 1.5, %v523_v60 }
  0xd9   :  { %v1384_v0 = vpop.eup %769  ;;  %v505_v36 = vmul.f32 %v764_v12, %v504_v27  ;;  %v531_v23 = vmul.f32 %v1376_v62, %v1342_v28  ;;  %v1391_v59 = vadd.f32 1e-05, %v467_v61  ;;  %vm537_vm7 = vweird.f32 %v1376_v62 }
  0xda   :  { %v772_v44 = vpop.eup %771  ;;  %v551_v31 = vmul.f32 %v1384_v0, %v1348_v37  ;;  %v525_v35 = vmul.f32 %v1344_v52, %v524_v49  ;;  %vm557_vm9 = vweird.f32 %v1384_v0  ;;  %vm1430_vm10 = vmor %vm536_vm3, %vm537_vm7 }
  0xdb   :  { %v509_v56 = vsel %vm1378_vm1, %v764_v12, %v505_v36  ;;  %v481_v63 = vmul.f32 %v772_v44, %v1352_v10  ;;  %v532_v11 = vmul.f32 %v1376_v62, %v531_v23  ;;  %773 = vrsqrt.f32 %v1391_v59  ;;  %vm558_vm12 = vmor %vm556_vm6, %vm557_vm9 }
  0xdc   :  { %v570_v30 = vmul.f32 %v562_v51, %v509_v56  ;;  %v577_v12 = vmul.f32 %v1090_v38, %v569_v13  ;;  %vm487_vm2 = vweird.f32 %v772_v44  ;;  %v552_v7 = vmul.f32 %v1384_v0, %v551_v31  ;;  %v445_v43 = vpop.xlane.xlu0 %444 }
  0xdd   :  { %v482_v17 = vmul.f32 %v772_v44, %v481_v63  ;;  %v533_v53 = vmul.f32 0.5, %v532_v11  ;;  %v529_v47 = vsel %vm1404_vm8, %v1344_v52, %v525_v35  ;;  %v454_v20 = vmul.f32 %v445_v43, %v975_v54  ;;  %vm488_vm11 = vmor %vm486_vm5, %vm487_vm2 }
  0xde   :  { %v578_v33 = vmul.f32 %v1090_v38, %v570_v30  ;;  %v585_v24 = vadd.f32 %v1112_v57, %v577_v12  ;;  %v572_v22 = vmul.f32 %v564_v32, %v529_v47  ;;  %v553_v6 = vmul.f32 0.5, %v552_v7 }
  0xdf   :  { %v483_v42 = vmul.f32 0.5, %v482_v17  ;;  %v534_v29 = vsub.f32 1.5, %v533_v53  ;;  %v470_v51 = vsub.f32 %v454_v20, %v462_v5  ;;  %vm516_vm13 = vweird.f32 %v1391_v59 }
  0xe0   :  { %v586_v3 = vadd.f32 %v1112_v57, %v578_v33  ;;  %713 = vst [vmem:[%s1588_s4 + $0x60] sm:$0xff] %v585_v24  ;;  %v580_v48 = vmul.f32 %v1090_v38, %v572_v22  ;;  %v554_v27 = vsub.f32 1.5, %v553_v6  ;;  %v563_v13 = vsub.f32 %v912_v16, %v1339_v25 }
  0xe1   :  { %v484_v52 = vsub.f32 1.5, %v483_v42  ;;  %v774_v5 = vpop.eup %773  ;;  %v535_v1 = vmul.f32 %v1376_v62, %v534_v29  ;;  %v478_v28 = vadd.f32 1e-05, %v470_v51  ;;  %v566_v17 = vsub.f32 %v883_v2, %v1357_v14 }
  0xe2   :  { %714 = vst [vmem:[%s1588_s4 + $0x68] sm:$0xff] %v586_v3  ;;  %v588_v15 = vadd.f32 %v1112_v57, %v580_v48  ;;  %v511_v8 = vmul.f32 %v774_v5, %v1391_v59  ;;  %v555_v18 = vmul.f32 %v1384_v0, %v554_v27  ;;  %vm517_vm14 = vweird.f32 %v774_v5 }
  0xe3   :  { %v485_v60 = vmul.f32 %v772_v44, %v484_v52  ;;  %v539_v21 = vsel %vm1430_vm10, %v1376_v62, %v535_v1  ;;  %775 = vrsqrt.f32 %v478_v28  ;;  %vm518_vm15 = vmor %vm516_vm13, %vm517_vm14  ;;  %vm546_vm0 = vweird.f32 %v478_v28 }
  0xe4   :  { %v573_v61 = vmul.f32 %v565_v34, %v539_v21  ;;  %716 = vst [vmem:[%s1588_s4 + $0x78] sm:$0xff] %v588_v15  ;;  %v512_v4 = vmul.f32 %v774_v5, %v511_v8  ;;  %v559_v37 = vsel %vm558_vm12, %v1384_v0, %v555_v18 }
  0xe5   :  { %v489_v10 = vsel %vm488_vm11, %v772_v44, %v485_v60  ;;  %v575_v62 = vmul.f32 %v567_v46, %v559_v37 }
  0xe6   :  { %v568_v26 = vmul.f32 %v560_v9, %v489_v10  ;;  %v581_v36 = vmul.f32 %v1090_v38, %v573_v61  ;;  %v513_v23 = vmul.f32 0.5, %v512_v4 }
  0xe7   :  { %v583_v31 = vmul.f32 %v1090_v38, %v575_v62 }
  0xe8   :  { %v576_v49 = vmul.f32 %v1090_v38, %v568_v26  ;;  %v589_v44 = vadd.f32 %v1112_v57, %v581_v36  ;;  %v514_v41 = vsub.f32 1.5, %v513_v23 }
  0xe9   :  { %v776_v56 = vpop.eup %775  ;;  %v591_v63 = vadd.f32 %v1112_v57, %v583_v31 }
  0xea   :  { %v584_v59 = vadd.f32 %v1112_v57, %v576_v49  ;;  %717 = vst [vmem:[%s1588_s4 + $0x80] sm:$0xff] %v589_v44  ;;  %v515_v0 = vmul.f32 %v774_v5, %v514_v41  ;;  %v541_v58 = vmul.f32 %v776_v56, %v478_v28  ;;  %vm547_vm1 = vweird.f32 %v776_v56 }
  0xeb   :  { %719 = vst [vmem:[%s1588_s4 + $0x90] sm:$0xff] %v591_v63  ;;  %vm548_vm3 = vmor %vm546_vm0, %vm547_vm1 }
  0xec   :  { %712 = vst [vmem:[%s1588_s4 + $0x58] sm:$0xff] %v584_v59  ;;  %v519_v30 = vsel %vm518_vm15, %v774_v5, %v515_v0  ;;  %v542_v16 = vmul.f32 %v776_v56, %v541_v58 }
  0xed   :  { %v571_v25 = vmul.f32 %v563_v13, %v519_v30 }
  0xee   :  { %v543_v11 = vmul.f32 0.5, %v542_v16 }
  0xef   :  { %v579_v35 = vmul.f32 %v1090_v38, %v571_v25 }
  0xf0   :  { %v544_v12 = vsub.f32 1.5, %v543_v11 }
  0xf1   :  { %v587_v7 = vadd.f32 %v1112_v57, %v579_v35 }
  0xf2   :  { %v545_v43 = vmul.f32 %v776_v56, %v544_v12 }
  0xf3   :  { %715 = vst [vmem:[%s1588_s4 + $0x70] sm:$0xff] %v587_v7 }
  0xf4   :  { %v549_v33 = vsel %vm548_vm3, %v776_v56, %v545_v43 }
  0xf5   :  { %v574_v53 = vmul.f32 %v566_v17, %v549_v33 }
  0xf7   :  { %v582_v47 = vmul.f32 %v1090_v38, %v574_v53 }
  0xf9   :  { %v590_v20 = vadd.f32 %v1112_v57, %v582_v47 }
  0xfb   :  { %718 = vst [vmem:[%s1588_s4 + $0x88] sm:$0xff] %v590_v20 }
 0x10f   :  { %v314_v24 = vpop.xlane.xlu1 %313 }
 0x110   :  { %v1491_v22 = vmul.f32 %v314_v24, %v975_v54 }
 0x112   :  { %v337_v51 = vmul.f32 %v1491_v22, %v1491_v22  ;;  %v376_v47 = vsub.f32 %v996_v19, %v1491_v22 }
 0x116   :  { %v320_v2 = vpop.xlane.xlu0 %319 }
 0x117   :  { %v624_v14 = vpop.xlane.xlu1 %623  ;;  %v316_v42 = vpop.xlane.xlu2 %315  ;;  %v1503_v5 = vmul.f32 %v320_v2, %v975_v54 }
 0x118   :  { %v1500_v48 = vmul.f32 %v316_v42, %v975_v54  ;;  %v1515_v36 = vmul.f32 %v624_v14, %v975_v54 }
 0x119   :  { %v339_v15 = vmul.f32 %v1503_v5, %v1503_v5  ;;  %v378_v19 = vsub.f32 %v1021_v40, %v1503_v5 }
 0x11a   :  { %v338_v8 = vmul.f32 %v1500_v48, %v1500_v48  ;;  %v646_v13 = vmul.f32 %v1515_v36, %v1515_v36 }
 0x11e   :  { %v629_v6 = vpop.xlane.xlu0 %628 }
 0x11f   :  { %v328_v3 = vpop.xlane.xlu1 %327  ;;  %v626_v29 = vpop.xlane.xlu2 %625  ;;  %v1520_v44 = vmul.f32 %v629_v6, %v975_v54 }
 0x120   :  { %v334_v34 = vmul.f32 %v328_v3, %v975_v54  ;;  %v1497_v32 = vmul.f32 %v626_v29, %v975_v54 }
 0x121   :  { %v648_v59 = vmul.f32 %v1520_v44, %v1520_v44 }
 0x122   :  { %v340_v52 = vsub.f32 %v334_v34, %v337_v51  ;;  %v647_v1 = vmul.f32 %v1497_v32, %v1497_v32 }
 0x124   :  { %v343_v27 = vadd.f32 1e-05, %v340_v52 }
 0x126   :  { %777 = vrsqrt.f32 %v343_v27  ;;  %v639_v9 = vpop.xlane.xlu0 %638  ;;  %vm352_vm5 = vweird.f32 %v343_v27 }
 0x127   :  { %v644_v28 = vmul.f32 %v639_v9, %v975_v54  ;;  %v333_v46 = vpop.xlane.xlu2 %332  ;;  %v330_v60 = vpop.xlane.xlu1 %329 }
 0x128   :  { %v336_v21 = vmul.f32 %v333_v46, %v975_v54  ;;  %v335_v18 = vmul.f32 %v330_v60, %v975_v54  ;;  %v686_v46 = vsub.f32 %v1101_v55, %v1497_v32 }
 0x129   :  { %v650_v10 = vsub.f32 %v644_v28, %v647_v1 }
 0x12a   :  { %v342_v61 = vsub.f32 %v336_v21, %v339_v15  ;;  %v341_v4 = vsub.f32 %v335_v18, %v338_v8  ;;  %v377_v21 = vsub.f32 %v1041_v50, %v1500_v48 }
 0x12b   :  { %v653_v26 = vadd.f32 1e-05, %v650_v10 }
 0x12c   :  { %v778_v37 = vpop.eup %777  ;;  %v345_v23 = vadd.f32 1e-05, %v342_v61  ;;  %v1517_v62 = vadd.f32 1e-05, %v341_v4 }
 0x12d   :  { %v347_v49 = vmul.f32 %v778_v37, %v343_v27  ;;  %779 = vrsqrt.f32 %v653_v26  ;;  %vm353_vm4 = vweird.f32 %v778_v37  ;;  %vm671_vm8 = vweird.f32 %v653_v26 }
 0x12e   :  { %781 = vrsqrt.f32 %v345_v23  ;;  %vm354_vm6 = vmor %vm352_vm5, %vm353_vm4  ;;  %vm372_vm11 = vweird.f32 %v345_v23  ;;  %vm362_vm13 = vweird.f32 %v1517_v62 }
 0x12f   :  { %v348_v41 = vmul.f32 %v778_v37, %v347_v49  ;;  %783 = vrsqrt.f32 %v1517_v62  ;;  %v637_v31 = vpop.xlane.xlu2 %636  ;;  %v642_v56 = vpop.xlane.xlu1 %641 }
 0x130   :  { %v643_v0 = vmul.f32 %v637_v31, %v975_v54  ;;  %v645_v63 = vmul.f32 %v642_v56, %v975_v54 }
 0x131   :  { %v349_v58 = vmul.f32 0.5, %v348_v41 }
 0x132   :  { %v649_v30 = vsub.f32 %v643_v0, %v646_v13  ;;  %v651_v16 = vsub.f32 %v645_v63, %v648_v59  ;;  %v685_v0 = vsub.f32 %v1019_v39, %v1515_v36 }
 0x133   :  { %v780_v25 = vpop.eup %779  ;;  %v350_v11 = vsub.f32 1.5, %v349_v58  ;;  %v687_v58 = vsub.f32 %v1030_v45, %v1520_v44 }
 0x134   :  { %v782_v35 = vpop.eup %781  ;;  %v666_v12 = vmul.f32 %v780_v25, %v653_v26  ;;  %v1529_v17 = vadd.f32 1e-05, %v649_v30  ;;  %v1531_v7 = vadd.f32 1e-05, %v651_v16  ;;  %vm672_vm7 = vweird.f32 %v780_v25 }
 0x135   :  { %v784_v43 = vpop.eup %783  ;;  %v351_v33 = vmul.f32 %v778_v37, %v350_v11  ;;  %v367_v53 = vmul.f32 %v782_v35, %v345_v23  ;;  %vm373_vm2 = vweird.f32 %v782_v35  ;;  %vm673_vm10 = vmor %vm671_vm8, %vm672_vm7 }
 0x136   :  { %v667_v54 = vmul.f32 %v780_v25, %v666_v12  ;;  %v357_v20 = vmul.f32 %v784_v43, %v1517_v62  ;;  %785 = vrsqrt.f32 %v1529_v17  ;;  %vm363_vm9 = vweird.f32 %v784_v43  ;;  %vm374_vm12 = vmor %vm372_vm11, %vm373_vm2 }
 0x137   :  { %v355_v24 = vsel %vm354_vm6, %v778_v37, %v351_v33  ;;  %v368_v2 = vmul.f32 %v782_v35, %v367_v53  ;;  %787 = vrsqrt.f32 %v1531_v7  ;;  %vm364_vm14 = vmor %vm362_vm13, %vm363_vm9  ;;  %vm661_vm1 = vweird.f32 %v1529_v17 }
 0x138   :  { %v379_v14 = vmul.f32 %v376_v47, %v355_v24  ;;  %v668_v42 = vmul.f32 0.5, %v667_v54  ;;  %v358_v6 = vmul.f32 %v784_v43, %v357_v20  ;;  %vm681_vm4 = vweird.f32 %v1531_v7 }
 0x139   :  { %v369_v3 = vmul.f32 0.5, %v368_v2 }
 0x13a   :  { %v382_v29 = vmul.f32 %v1090_v38, %v379_v14  ;;  %v669_v51 = vsub.f32 1.5, %v668_v42  ;;  %v359_v34 = vmul.f32 0.5, %v358_v6 }
 0x13b   :  { %v370_v22 = vsub.f32 1.5, %v369_v3 }
 0x13c   :  { %v786_v52 = vpop.eup %785  ;;  %v385_v27 = vadd.f32 %v1112_v57, %v382_v29  ;;  %v670_v9 = vmul.f32 %v780_v25, %v669_v51  ;;  %v360_v1 = vsub.f32 1.5, %v359_v34 }
 0x13d   :  { %v788_v28 = vpop.eup %787  ;;  %v371_v60 = vmul.f32 %v782_v35, %v370_v22  ;;  %v656_v15 = vmul.f32 %v786_v52, %v1529_v17  ;;  %vm662_vm15 = vweird.f32 %v786_v52 }
 0x13e   :  { %388 = vst [vmem:[%s1588_s4 + $0x40] sm:$0xff] %v385_v27  ;;  %v674_v40 = vsel %vm673_vm10, %v780_v25, %v670_v9  ;;  %v361_v5 = vmul.f32 %v784_v43, %v360_v1  ;;  %v676_v8 = vmul.f32 %v788_v28, %v1531_v7  ;;  %vm682_vm0 = vweird.f32 %v788_v28  ;;  %vm663_vm3 = vmor %vm661_vm1, %vm662_vm15 }
 0x13f   :  { %v689_v55 = vmul.f32 %v686_v46, %v674_v40  ;;  %v375_v32 = vsel %vm374_vm12, %v782_v35, %v371_v60  ;;  %v657_v18 = vmul.f32 %v786_v52, %v656_v15  ;;  %vm683_vm5 = vmor %vm681_vm4, %vm682_vm0 }
 0x140   :  { %v381_v10 = vmul.f32 %v378_v19, %v375_v32  ;;  %v365_v61 = vsel %vm364_vm14, %v784_v43, %v361_v5  ;;  %v677_v4 = vmul.f32 %v788_v28, %v676_v8 }
 0x141   :  { %v692_v26 = vmul.f32 %v1090_v38, %v689_v55  ;;  %v380_v37 = vmul.f32 %v377_v21, %v365_v61  ;;  %v658_v23 = vmul.f32 0.5, %v657_v18 }
 0x142   :  { %v384_v49 = vmul.f32 %v1090_v38, %v381_v10  ;;  %v678_v62 = vmul.f32 0.5, %v677_v4 }
 0x143   :  { %v695_v41 = vadd.f32 %v1112_v57, %v692_v26  ;;  %v383_v31 = vmul.f32 %v1090_v38, %v380_v37  ;;  %v659_v50 = vsub.f32 1.5, %v658_v23 }
 0x144   :  { %v387_v48 = vadd.f32 %v1112_v57, %v384_v49  ;;  %v679_v56 = vsub.f32 1.5, %v678_v62 }
 0x145   :  { %723 = vst [vmem:[%s1588_s4 + $0xa0] sm:$0xff] %v695_v41  ;;  %v386_v13 = vadd.f32 %v1112_v57, %v383_v31  ;;  %v660_v59 = vmul.f32 %v786_v52, %v659_v50 }
 0x146   :  { %390 = vst [vmem:[%s1588_s4 + $0x50] sm:$0x1f] %v387_v48  ;;  %v680_v63 = vmul.f32 %v788_v28, %v679_v56 }
 0x147   :  { %389 = vst [vmem:[%s1588_s4 + $0x48] sm:$0xff] %v386_v13  ;;  %v664_v30 = vsel %vm663_vm3, %v786_v52, %v660_v59 }
 0x148   :  { %v688_v16 = vmul.f32 %v685_v0, %v664_v30  ;;  %v684_v25 = vsel %vm683_vm5, %v788_v28, %v680_v63 }
 0x149   :  { %v690_v39 = vmul.f32 %v687_v58, %v684_v25 }
 0x14a   :  { %v691_v36 = vmul.f32 %v1090_v38, %v688_v16 }
 0x14b   :  { %v693_v11 = vmul.f32 %v1090_v38, %v690_v39 }
 0x14c   :  { %v694_v35 = vadd.f32 %v1112_v57, %v691_v36 }
 0x14d   :  { %v696_v12 = vadd.f32 %v1112_v57, %v693_v11 }
 0x14e   :  { %722 = vst [vmem:[%s1588_s4 + $0x98] sm:$0xff] %v694_v35 }
 0x14f   :  { %724 = vst [vmem:[%s1588_s4 + $0xa8] sm:$0x1f] %v696_v12 }
 0x150   :  { %704 = vsyncpa [#allocation3], 1 }
 0x151   :  { %705 = vsyncpa [#allocation5], 1 }

</bundles_post_ra>
